<compile_context>
chip_gen: v6e
topology: v6e:2x2x1
jax: 0.10.0
libtpu: 0.0.40
codegen_flags: <defaults>
</compile_context>

<pallas_src>
import math

import jax
import jax.numpy as jnp
from jax.experimental import pallas as pl
from jax.experimental.pallas import tpu as pltpu


SUBLANE = 8  # f32 sublane tile height


# ---------------------------------------------------------------------------
# Fused Pallas kernel (built per static model config)
# ---------------------------------------------------------------------------
def make_fused_lstm_fc_kernel(seq_len, batch_pad, hidden_size, output_size,
                              num_layers):
    S, Bp, H, O = seq_len, batch_pad, hidden_size, output_size

    def kernel(*refs):
        # refs: x_flat, (wih_t, whh_t, bias) * L, fc_w, fc_b, out, hs_scratch
        x_ref = refs[0]
        fcw_ref = refs[1 + 3 * num_layers]
        fcb_ref = refs[2 + 3 * num_layers]
        out_ref = refs[3 + 3 * num_layers]
        hs_ref = refs[4 + 3 * num_layers]

        def run_layer(inp_flat, wih_ref, whh_ref, b_ref, write_hs):
            # Hoisted input projection for ALL timesteps in one MXU matmul,
            # combined (b_ih + b_hh) bias folded in once.
            proj = (jnp.dot(inp_flat, wih_ref[...],
                            preferred_element_type=jnp.float32)
                    + b_ref[...])                          # (S*Bp, 4H)
            proj = proj.reshape(S, Bp, 4 * H)
            whh = whh_ref[...]                             # (H, 4H), hoisted

            h = jnp.zeros((Bp, H), jnp.float32)
            c = jnp.zeros((Bp, H), jnp.float32)
            # S is small & static -> fully unrolled (max LLO visibility).
            for t in range(S):
                # One fused recurrent matmul + one VPU add of the whole slab.
                z = proj[t] + jnp.dot(h, whh,
                                      preferred_element_type=jnp.float32)
                sg = jax.nn.sigmoid(z)      # one EUP pass over the full (Bp,4H)
                th = jnp.tanh(z)            # one EUP pass over the full (Bp,4H)
                gi = sg[:, 0 * H:1 * H]
                gf = sg[:, 1 * H:2 * H]
                gg = th[:, 2 * H:3 * H]
                go = sg[:, 3 * H:4 * H]
                c = gf * c + gi * gg
                h = go * jnp.tanh(c)
                if write_hs:
                    hs_ref[t] = h           # idle vst slot; bounds live ranges
            return h

        # Input arrives already time-major, batch-padded and flat: (S*Bp, F).
        cur = x_ref[...].astype(jnp.float32)
        h_last = None
        for layer in range(num_layers):
            wih_ref = refs[1 + 3 * layer]
            whh_ref = refs[2 + 3 * layer]
            b_ref = refs[3 + 3 * layer]
            last = (layer + 1 == num_layers)
            h_last = run_layer(cur, wih_ref, whh_ref, b_ref,
                               write_hs=not last)
            if not last:
                # Tile-aligned (S, Bp, H) -> (S*Bp, H); h_seq never leaves VMEM.
                cur = hs_ref[...].reshape(S * Bp, H)

        # fc applied to the LAST time step only (== fc(lstm_out)[-1]).
        if O == 1:
            # (Bp,H)·(H,) as VPU multiply + cross-lane reduce; skip the MXU.
            y = (jnp.sum(h_last * fcw_ref[...], axis=-1, keepdims=True)
                 + fcb_ref[...])
        else:
            y = jax.lax.dot_general(
                h_last, fcw_ref[...], (((1,), (1,)), ((), ())),
                preferred_element_type=jnp.float32) + fcb_ref[...]
        out_ref[...] = y.astype(out_ref.dtype)

    return kernel


# ---------------------------------------------------------------------------
# Wrapper
# ---------------------------------------------------------------------------
def lstm_model_forward(x, params):
    """x: (batch, seq, input_size) float32 -> (batch, output_size)."""
    B, S, F = x.shape
    layers = params["lstm_layers"]
    num_layers = len(layers)
    H = layers[0][1].shape[-1]                 # w_hh: (4H, H)
    O = params["fc_w"].shape[0]

    Bp = ((B + SUBLANE - 1) // SUBLANE) * SUBLANE   # pad batch to sublane tile

    # input.transpose(0, 1): time-major (S, B, F); pad + flatten OUTSIDE the
    # kernel so no relayout copy happens at kernel start.
    x_t = jnp.transpose(x, (1, 0, 2)).astype(jnp.float32)       # (S, B, F)
    x_t = jnp.pad(x_t, ((0, 0), (0, Bp - B), (0, 0)))            # (S, Bp, F)
    x_flat = x_t.reshape(S * Bp, F)

    flat_inputs = [x_flat]
    for (w_ih, w_hh, b_ih, b_hh) in layers:
        wih_t = jnp.transpose(w_ih)            # (in_f, 4H)  for x @ W_ih^T
        whh_t = jnp.transpose(w_hh)            # (H, 4H)     single fused W_hh
        bias = (b_ih + b_hh)[None, :]          # (1, 4H)     folded once
        flat_inputs.extend([wih_t, whh_t, bias])
    flat_inputs.append(params["fc_w"])         # (O, H)
    flat_inputs.append(params["fc_b"][None, :])  # (1, O)

    kernel = make_fused_lstm_fc_kernel(S, Bp, H, O, num_layers)
    out_pad = pl.pallas_call(
        kernel,
        out_shape=jax.ShapeDtypeStruct((Bp, O), jnp.float32),
        in_specs=[pl.BlockSpec(memory_space=pltpu.MemorySpace.VMEM)
                  for _ in flat_inputs],
        out_specs=pl.BlockSpec(memory_space=pltpu.MemorySpace.VMEM),
        scratch_shapes=[pltpu.VMEM((S, Bp, H), jnp.float32)],   # h_seq buffer
    )(*flat_inputs)
    return out_pad[:B]


# ---------------------------------------------------------------------------
# Deterministic parameter init (raw nn.LSTM / nn.Linear shaped weights)
# ---------------------------------------------------------------------------
def init_params(key, input_size, hidden_size, num_layers, output_size):
    H = hidden_size
    k = 1.0 / math.sqrt(H)
    layers = []
    for layer in range(num_layers):
        in_f = input_size if layer == 0 else H
        key, k1, k2, k3, k4 = jax.random.split(key, 5)
        w_ih = jax.random.uniform(k1, (4 * H, in_f), jnp.float32, -k, k)
        w_hh = jax.random.uniform(k2, (4 * H, H), jnp.float32, -k, k)
        b_ih = jax.random.uniform(k3, (4 * H,), jnp.float32, -k, k)
        b_hh = jax.random.uniform(k4, (4 * H,), jnp.float32, -k, k)
        layers.append((w_ih, w_hh, b_ih, b_hh))
    key, k5, k6 = jax.random.split(key, 3)
    fc_w = jax.random.uniform(k5, (output_size, H), jnp.float32, -k, k)
    fc_b = jax.random.uniform(k6, (output_size,), jnp.float32, -k, k)
    return {"lstm_layers": layers, "fc_w": fc_w, "fc_b": fc_b}


# ---------------------------------------------------------------------------
# Pure-JAX reference implementing PyTorch semantics directly from raw weights
# ---------------------------------------------------------------------------
def reference_forward(x, params):
    h_seq = jnp.transpose(x, (1, 0, 2)).astype(jnp.float32)     # (S, B, F)
    for (w_ih, w_hh, b_ih, b_hh) in params["lstm_layers"]:
        S, B, _ = h_seq.shape
        H = w_hh.shape[-1]
        h = jnp.zeros((B, H), jnp.float32)
        c = jnp.zeros((B, H), jnp.float32)
        outs = []
        for t in range(S):
            gates = h_seq[t] @ w_ih.T + h @ w_hh.T + b_ih + b_hh
            i_g = jax.nn.sigmoid(gates[:, 0 * H:1 * H])
            f_g = jax.nn.sigmoid(gates[:, 1 * H:2 * H])
            g_g = jnp.tanh(gates[:, 2 * H:3 * H])
            o_g = jax.nn.sigmoid(gates[:, 3 * H:4 * H])
            c = f_g * c + i_g * g_g
            h = o_g * jnp.tanh(c)
            outs.append(h)
        h_seq = jnp.stack(outs, axis=0)
    return h_seq[-1] @ params["fc_w"].T + params["fc_b"]


if __name__ == "__main__":
    # x: (batch, seq, input_size) — small shapes consistent with the module.
    batch, seq, input_size = 2, 8, 4
    hidden_size, num_layers, output_size = 32, 2, 1

    key = jax.random.PRNGKey(0)
    key, kx, kp = jax.random.split(key, 3)
    x = jax.random.normal(kx, (batch, seq, input_size), jnp.float32)
    params = init_params(kp, input_size, hidden_size, num_layers, output_size)

    y = lstm_model_forward(x, params)
    y = jax.block_until_ready(y)

    y_ref = reference_forward(x, params)
    assert y.shape == (batch, output_size)
    assert jnp.allclose(y, y_ref, atol=1e-4, rtol=1e-4), (
        f"max abs err {jnp.max(jnp.abs(y - y_ref))}")

    print("KERNEL_OK")
</pallas_src>

<mosaic_0001>
module attributes {stable_mosaic.version = 11 : i64} {
  func.func @kernel(%arg0: memref<64x4xf32, #tpu.memory_space<vmem>>, %arg1: memref<4x128xf32, #tpu.memory_space<vmem>>, %arg2: memref<32x128xf32, #tpu.memory_space<vmem>>, %arg3: memref<1x128xf32, #tpu.memory_space<vmem>>, %arg4: memref<32x128xf32, #tpu.memory_space<vmem>>, %arg5: memref<32x128xf32, #tpu.memory_space<vmem>>, %arg6: memref<1x128xf32, #tpu.memory_space<vmem>>, %arg7: memref<1x32xf32, #tpu.memory_space<vmem>>, %arg8: memref<1x1xf32, #tpu.memory_space<vmem>>, %arg9: memref<8x1xf32, #tpu.memory_space<vmem>>, %arg10: memref<8x8x32xf32, #tpu.memory_space<vmem>>) attributes {dimension_semantics = [], scalar_prefetch = 0 : i64, scratch_operands = 1 : i64, tpu.core_type = #tpu.core_type<tc>} {
    %c0 = arith.constant 0 : index
    %c0_0 = arith.constant 0 : index
    %0 = vector.load %arg0[%c0, %c0_0] : memref<64x4xf32, #tpu.memory_space<vmem>>, vector<64x4xf32>
    %c0_1 = arith.constant 0 : index
    %c0_2 = arith.constant 0 : index
    %1 = vector.load %arg1[%c0_1, %c0_2] : memref<4x128xf32, #tpu.memory_space<vmem>>, vector<4x128xf32>
    %cst = arith.constant dense<0.000000e+00> : vector<64x128xf32>
    %2 = tpu.matmul %0, %1, %cst {dimension_numbers = #tpu.dot_dimension_numbers<[1], [0], [0], [1], [0, 0, 1, 1], [], []>} : vector<64x4xf32>, vector<4x128xf32>, vector<64x128xf32> -> vector<64x128xf32>
    %c0_3 = arith.constant 0 : index
    %c0_4 = arith.constant 0 : index
    %3 = vector.load %arg3[%c0_3, %c0_4] : memref<1x128xf32, #tpu.memory_space<vmem>>, vector<1x128xf32>
    %4 = vector.broadcast %3 : vector<1x128xf32> to vector<64x128xf32>
    %5 = arith.addf %2, %4 : vector<64x128xf32>
    %6 = vector.shape_cast %5 : vector<64x128xf32> to vector<8x8x128xf32>
    %c0_5 = arith.constant 0 : index
    %c0_6 = arith.constant 0 : index
    %7 = vector.load %arg2[%c0_5, %c0_6] : memref<32x128xf32, #tpu.memory_space<vmem>>, vector<32x128xf32>
    %cst_7 = arith.constant 0.000000e+00 : f32
    %8 = vector.broadcast %cst_7 : f32 to vector<8x32xf32>
    %cst_8 = arith.constant 0.000000e+00 : f32
    %9 = vector.broadcast %cst_8 : f32 to vector<8x32xf32>
    %10 = vector.extract_strided_slice %6 {offsets = [0, 0, 0], sizes = [1, 8, 128], strides = [1, 1, 1]} : vector<8x8x128xf32> to vector<1x8x128xf32>
    %11 = vector.shape_cast %10 : vector<1x8x128xf32> to vector<8x128xf32>
    %cst_9 = arith.constant dense<0.000000e+00> : vector<8x128xf32>
    %12 = tpu.matmul %8, %7, %cst_9 {dimension_numbers = #tpu.dot_dimension_numbers<[1], [0], [0], [1], [0, 0, 1, 1], [], []>} : vector<8x32xf32>, vector<32x128xf32>, vector<8x128xf32> -> vector<8x128xf32>
    %13 = arith.addf %11, %12 : vector<8x128xf32>
    %14 = arith.negf %13 : vector<8x128xf32>
    %15 = math.exp %14 : vector<8x128xf32>
    %cst_10 = arith.constant 1.000000e+00 : f32
    %16 = vector.broadcast %cst_10 : f32 to vector<8x128xf32>
    %17 = arith.addf %16, %15 : vector<8x128xf32>
    %18 = arith.divf %16, %17 : vector<8x128xf32>
    %19 = math.tanh %13 : vector<8x128xf32>
    %20 = vector.extract_strided_slice %18 {offsets = [0, 0], sizes = [8, 32], strides = [1, 1]} : vector<8x128xf32> to vector<8x32xf32>
    %21 = vector.extract_strided_slice %18 {offsets = [0, 32], sizes = [8, 32], strides = [1, 1]} : vector<8x128xf32> to vector<8x32xf32>
    %22 = vector.extract_strided_slice %19 {offsets = [0, 64], sizes = [8, 32], strides = [1, 1]} : vector<8x128xf32> to vector<8x32xf32>
    %23 = vector.extract_strided_slice %18 {offsets = [0, 96], sizes = [8, 32], strides = [1, 1]} : vector<8x128xf32> to vector<8x32xf32>
    %24 = arith.mulf %21, %9 : vector<8x32xf32>
    %25 = arith.mulf %20, %22 : vector<8x32xf32>
    %26 = arith.addf %24, %25 : vector<8x32xf32>
    %27 = math.tanh %26 : vector<8x32xf32>
    %28 = arith.mulf %23, %27 : vector<8x32xf32>
    %c0_11 = arith.constant 0 : index
    %c0_12 = arith.constant 0 : index
    %c0_13 = arith.constant 0 : index
    %29 = vector.load %arg10[%c0_11, %c0_12, %c0_13] : memref<8x8x32xf32, #tpu.memory_space<vmem>>, vector<1x8x32xf32>
    %30 = vector.shape_cast %29 : vector<1x8x32xf32> to vector<8x32xf32>
    %31 = vector.shape_cast %28 : vector<8x32xf32> to vector<1x8x32xf32>
    tpu.vector_store %arg10[%c0_11, %c0_12, %c0_13], %31 {strides = array<i32>} : memref<8x8x32xf32, #tpu.memory_space<vmem>>, vector<1x8x32xf32>,
    %32 = vector.extract_strided_slice %6 {offsets = [1, 0, 0], sizes = [1, 8, 128], strides = [1, 1, 1]} : vector<8x8x128xf32> to vector<1x8x128xf32>
    %33 = vector.shape_cast %32 : vector<1x8x128xf32> to vector<8x128xf32>
    %cst_14 = arith.constant dense<0.000000e+00> : vector<8x128xf32>
    %34 = tpu.matmul %28, %7, %cst_14 {dimension_numbers = #tpu.dot_dimension_numbers<[1], [0], [0], [1], [0, 0, 1, 1], [], []>} : vector<8x32xf32>, vector<32x128xf32>, vector<8x128xf32> -> vector<8x128xf32>
    %35 = arith.addf %33, %34 : vector<8x128xf32>
    %36 = arith.negf %35 : vector<8x128xf32>
    %37 = math.exp %36 : vector<8x128xf32>
    %cst_15 = arith.constant 1.000000e+00 : f32
    %38 = vector.broadcast %cst_15 : f32 to vector<8x128xf32>
    %39 = arith.addf %38, %37 : vector<8x128xf32>
    %40 = arith.divf %38, %39 : vector<8x128xf32>
    %41 = math.tanh %35 : vector<8x128xf32>
    %42 = vector.extract_strided_slice %40 {offsets = [0, 0], sizes = [8, 32], strides = [1, 1]} : vector<8x128xf32> to vector<8x32xf32>
    %43 = vector.extract_strided_slice %40 {offsets = [0, 32], sizes = [8, 32], strides = [1, 1]} : vector<8x128xf32> to vector<8x32xf32>
    %44 = vector.extract_strided_slice %41 {offsets = [0, 64], sizes = [8, 32], strides = [1, 1]} : vector<8x128xf32> to vector<8x32xf32>
    %45 = vector.extract_strided_slice %40 {offsets = [0, 96], sizes = [8, 32], strides = [1, 1]} : vector<8x128xf32> to vector<8x32xf32>
    %46 = arith.mulf %43, %26 : vector<8x32xf32>
    %47 = arith.mulf %42, %44 : vector<8x32xf32>
    %48 = arith.addf %46, %47 : vector<8x32xf32>
    %49 = math.tanh %48 : vector<8x32xf32>
    %50 = arith.mulf %45, %49 : vector<8x32xf32>
    %c1 = arith.constant 1 : index
    %c0_16 = arith.constant 0 : index
    %c0_17 = arith.constant 0 : index
    %51 = vector.load %arg10[%c1, %c0_16, %c0_17] : memref<8x8x32xf32, #tpu.memory_space<vmem>>, vector<1x8x32xf32>
    %52 = vector.shape_cast %51 : vector<1x8x32xf32> to vector<8x32xf32>
    %53 = vector.shape_cast %50 : vector<8x32xf32> to vector<1x8x32xf32>
    tpu.vector_store %arg10[%c1, %c0_16, %c0_17], %53 {strides = array<i32>} : memref<8x8x32xf32, #tpu.memory_space<vmem>>, vector<1x8x32xf32>,
    %54 = vector.extract_strided_slice %6 {offsets = [2, 0, 0], sizes = [1, 8, 128], strides = [1, 1, 1]} : vector<8x8x128xf32> to vector<1x8x128xf32>
    %55 = vector.shape_cast %54 : vector<1x8x128xf32> to vector<8x128xf32>
    %cst_18 = arith.constant dense<0.000000e+00> : vector<8x128xf32>
    %56 = tpu.matmul %50, %7, %cst_18 {dimension_numbers = #tpu.dot_dimension_numbers<[1], [0], [0], [1], [0, 0, 1, 1], [], []>} : vector<8x32xf32>, vector<32x128xf32>, vector<8x128xf32> -> vector<8x128xf32>
    %57 = arith.addf %55, %56 : vector<8x128xf32>
    %58 = arith.negf %57 : vector<8x128xf32>
    %59 = math.exp %58 : vector<8x128xf32>
    %cst_19 = arith.constant 1.000000e+00 : f32
    %60 = vector.broadcast %cst_19 : f32 to vector<8x128xf32>
    %61 = arith.addf %60, %59 : vector<8x128xf32>
    %62 = arith.divf %60, %61 : vector<8x128xf32>
    %63 = math.tanh %57 : vector<8x128xf32>
    %64 = vector.extract_strided_slice %62 {offsets = [0, 0], sizes = [8, 32], strides = [1, 1]} : vector<8x128xf32> to vector<8x32xf32>
    %65 = vector.extract_strided_slice %62 {offsets = [0, 32], sizes = [8, 32], strides = [1, 1]} : vector<8x128xf32> to vector<8x32xf32>
    %66 = vector.extract_strided_slice %63 {offsets = [0, 64], sizes = [8, 32], strides = [1, 1]} : vector<8x128xf32> to vector<8x32xf32>
    %67 = vector.extract_strided_slice %62 {offsets = [0, 96], sizes = [8, 32], strides = [1, 1]} : vector<8x128xf32> to vector<8x32xf32>
    %68 = arith.mulf %65, %48 : vector<8x32xf32>
    %69 = arith.mulf %64, %66 : vector<8x32xf32>
    %70 = arith.addf %68, %69 : vector<8x32xf32>
    %71 = math.tanh %70 : vector<8x32xf32>
    %72 = arith.mulf %67, %71 : vector<8x32xf32>
    %c2 = arith.constant 2 : index
    %c0_20 = arith.constant 0 : index
    %c0_21 = arith.constant 0 : index
    %73 = vector.load %arg10[%c2, %c0_20, %c0_21] : memref<8x8x32xf32, #tpu.memory_space<vmem>>, vector<1x8x32xf32>
    %74 = vector.shape_cast %73 : vector<1x8x32xf32> to vector<8x32xf32>
    %75 = vector.shape_cast %72 : vector<8x32xf32> to vector<1x8x32xf32>
    tpu.vector_store %arg10[%c2, %c0_20, %c0_21], %75 {strides = array<i32>} : memref<8x8x32xf32, #tpu.memory_space<vmem>>, vector<1x8x32xf32>,
    %76 = vector.extract_strided_slice %6 {offsets = [3, 0, 0], sizes = [1, 8, 128], strides = [1, 1, 1]} : vector<8x8x128xf32> to vector<1x8x128xf32>
    %77 = vector.shape_cast %76 : vector<1x8x128xf32> to vector<8x128xf32>
    %cst_22 = arith.constant dense<0.000000e+00> : vector<8x128xf32>
    %78 = tpu.matmul %72, %7, %cst_22 {dimension_numbers = #tpu.dot_dimension_numbers<[1], [0], [0], [1], [0, 0, 1, 1], [], []>} : vector<8x32xf32>, vector<32x128xf32>, vector<8x128xf32> -> vector<8x128xf32>
    %79 = arith.addf %77, %78 : vector<8x128xf32>
    %80 = arith.negf %79 : vector<8x128xf32>
    %81 = math.exp %80 : vector<8x128xf32>
    %cst_23 = arith.constant 1.000000e+00 : f32
    %82 = vector.broadcast %cst_23 : f32 to vector<8x128xf32>
    %83 = arith.addf %82, %81 : vector<8x128xf32>
    %84 = arith.divf %82, %83 : vector<8x128xf32>
    %85 = math.tanh %79 : vector<8x128xf32>
    %86 = vector.extract_strided_slice %84 {offsets = [0, 0], sizes = [8, 32], strides = [1, 1]} : vector<8x128xf32> to vector<8x32xf32>
    %87 = vector.extract_strided_slice %84 {offsets = [0, 32], sizes = [8, 32], strides = [1, 1]} : vector<8x128xf32> to vector<8x32xf32>
    %88 = vector.extract_strided_slice %85 {offsets = [0, 64], sizes = [8, 32], strides = [1, 1]} : vector<8x128xf32> to vector<8x32xf32>
    %89 = vector.extract_strided_slice %84 {offsets = [0, 96], sizes = [8, 32], strides = [1, 1]} : vector<8x128xf32> to vector<8x32xf32>
    %90 = arith.mulf %87, %70 : vector<8x32xf32>
    %91 = arith.mulf %86, %88 : vector<8x32xf32>
    %92 = arith.addf %90, %91 : vector<8x32xf32>
    %93 = math.tanh %92 : vector<8x32xf32>
    %94 = arith.mulf %89, %93 : vector<8x32xf32>
    %c3 = arith.constant 3 : index
    %c0_24 = arith.constant 0 : index
    %c0_25 = arith.constant 0 : index
    %95 = vector.load %arg10[%c3, %c0_24, %c0_25] : memref<8x8x32xf32, #tpu.memory_space<vmem>>, vector<1x8x32xf32>
    %96 = vector.shape_cast %95 : vector<1x8x32xf32> to vector<8x32xf32>
    %97 = vector.shape_cast %94 : vector<8x32xf32> to vector<1x8x32xf32>
    tpu.vector_store %arg10[%c3, %c0_24, %c0_25], %97 {strides = array<i32>} : memref<8x8x32xf32, #tpu.memory_space<vmem>>, vector<1x8x32xf32>,
    %98 = vector.extract_strided_slice %6 {offsets = [4, 0, 0], sizes = [1, 8, 128], strides = [1, 1, 1]} : vector<8x8x128xf32> to vector<1x8x128xf32>
    %99 = vector.shape_cast %98 : vector<1x8x128xf32> to vector<8x128xf32>
    %cst_26 = arith.constant dense<0.000000e+00> : vector<8x128xf32>
    %100 = tpu.matmul %94, %7, %cst_26 {dimension_numbers = #tpu.dot_dimension_numbers<[1], [0], [0], [1], [0, 0, 1, 1], [], []>} : vector<8x32xf32>, vector<32x128xf32>, vector<8x128xf32> -> vector<8x128xf32>
    %101 = arith.addf %99, %100 : vector<8x128xf32>
    %102 = arith.negf %101 : vector<8x128xf32>
    %103 = math.exp %102 : vector<8x128xf32>
    %cst_27 = arith.constant 1.000000e+00 : f32
    %104 = vector.broadcast %cst_27 : f32 to vector<8x128xf32>
    %105 = arith.addf %104, %103 : vector<8x128xf32>
    %106 = arith.divf %104, %105 : vector<8x128xf32>
    %107 = math.tanh %101 : vector<8x128xf32>
    %108 = vector.extract_strided_slice %106 {offsets = [0, 0], sizes = [8, 32], strides = [1, 1]} : vector<8x128xf32> to vector<8x32xf32>
    %109 = vector.extract_strided_slice %106 {offsets = [0, 32], sizes = [8, 32], strides = [1, 1]} : vector<8x128xf32> to vector<8x32xf32>
    %110 = vector.extract_strided_slice %107 {offsets = [0, 64], sizes = [8, 32], strides = [1, 1]} : vector<8x128xf32> to vector<8x32xf32>
    %111 = vector.extract_strided_slice %106 {offsets = [0, 96], sizes = [8, 32], strides = [1, 1]} : vector<8x128xf32> to vector<8x32xf32>
    %112 = arith.mulf %109, %92 : vector<8x32xf32>
    %113 = arith.mulf %108, %110 : vector<8x32xf32>
    %114 = arith.addf %112, %113 : vector<8x32xf32>
    %115 = math.tanh %114 : vector<8x32xf32>
    %116 = arith.mulf %111, %115 : vector<8x32xf32>
    %c4 = arith.constant 4 : index
    %c0_28 = arith.constant 0 : index
    %c0_29 = arith.constant 0 : index
    %117 = vector.load %arg10[%c4, %c0_28, %c0_29] : memref<8x8x32xf32, #tpu.memory_space<vmem>>, vector<1x8x32xf32>
    %118 = vector.shape_cast %117 : vector<1x8x32xf32> to vector<8x32xf32>
    %119 = vector.shape_cast %116 : vector<8x32xf32> to vector<1x8x32xf32>
    tpu.vector_store %arg10[%c4, %c0_28, %c0_29], %119 {strides = array<i32>} : memref<8x8x32xf32, #tpu.memory_space<vmem>>, vector<1x8x32xf32>,
    %120 = vector.extract_strided_slice %6 {offsets = [5, 0, 0], sizes = [1, 8, 128], strides = [1, 1, 1]} : vector<8x8x128xf32> to vector<1x8x128xf32>
    %121 = vector.shape_cast %120 : vector<1x8x128xf32> to vector<8x128xf32>
    %cst_30 = arith.constant dense<0.000000e+00> : vector<8x128xf32>
    %122 = tpu.matmul %116, %7, %cst_30 {dimension_numbers = #tpu.dot_dimension_numbers<[1], [0], [0], [1], [0, 0, 1, 1], [], []>} : vector<8x32xf32>, vector<32x128xf32>, vector<8x128xf32> -> vector<8x128xf32>
    %123 = arith.addf %121, %122 : vector<8x128xf32>
    %124 = arith.negf %123 : vector<8x128xf32>
    %125 = math.exp %124 : vector<8x128xf32>
    %cst_31 = arith.constant 1.000000e+00 : f32
    %126 = vector.broadcast %cst_31 : f32 to vector<8x128xf32>
    %127 = arith.addf %126, %125 : vector<8x128xf32>
    %128 = arith.divf %126, %127 : vector<8x128xf32>
    %129 = math.tanh %123 : vector<8x128xf32>
    %130 = vector.extract_strided_slice %128 {offsets = [0, 0], sizes = [8, 32], strides = [1, 1]} : vector<8x128xf32> to vector<8x32xf32>
    %131 = vector.extract_strided_slice %128 {offsets = [0, 32], sizes = [8, 32], strides = [1, 1]} : vector<8x128xf32> to vector<8x32xf32>
    %132 = vector.extract_strided_slice %129 {offsets = [0, 64], sizes = [8, 32], strides = [1, 1]} : vector<8x128xf32> to vector<8x32xf32>
    %133 = vector.extract_strided_slice %128 {offsets = [0, 96], sizes = [8, 32], strides = [1, 1]} : vector<8x128xf32> to vector<8x32xf32>
    %134 = arith.mulf %131, %114 : vector<8x32xf32>
    %135 = arith.mulf %130, %132 : vector<8x32xf32>
    %136 = arith.addf %134, %135 : vector<8x32xf32>
    %137 = math.tanh %136 : vector<8x32xf32>
    %138 = arith.mulf %133, %137 : vector<8x32xf32>
    %c5 = arith.constant 5 : index
    %c0_32 = arith.constant 0 : index
    %c0_33 = arith.constant 0 : index
    %139 = vector.load %arg10[%c5, %c0_32, %c0_33] : memref<8x8x32xf32, #tpu.memory_space<vmem>>, vector<1x8x32xf32>
    %140 = vector.shape_cast %139 : vector<1x8x32xf32> to vector<8x32xf32>
    %141 = vector.shape_cast %138 : vector<8x32xf32> to vector<1x8x32xf32>
    tpu.vector_store %arg10[%c5, %c0_32, %c0_33], %141 {strides = array<i32>} : memref<8x8x32xf32, #tpu.memory_space<vmem>>, vector<1x8x32xf32>,
    %142 = vector.extract_strided_slice %6 {offsets = [6, 0, 0], sizes = [1, 8, 128], strides = [1, 1, 1]} : vector<8x8x128xf32> to vector<1x8x128xf32>
    %143 = vector.shape_cast %142 : vector<1x8x128xf32> to vector<8x128xf32>
    %cst_34 = arith.constant dense<0.000000e+00> : vector<8x128xf32>
    %144 = tpu.matmul %138, %7, %cst_34 {dimension_numbers = #tpu.dot_dimension_numbers<[1], [0], [0], [1], [0, 0, 1, 1], [], []>} : vector<8x32xf32>, vector<32x128xf32>, vector<8x128xf32> -> vector<8x128xf32>
    %145 = arith.addf %143, %144 : vector<8x128xf32>
    %146 = arith.negf %145 : vector<8x128xf32>
    %147 = math.exp %146 : vector<8x128xf32>
    %cst_35 = arith.constant 1.000000e+00 : f32
    %148 = vector.broadcast %cst_35 : f32 to vector<8x128xf32>
    %149 = arith.addf %148, %147 : vector<8x128xf32>
    %150 = arith.divf %148, %149 : vector<8x128xf32>
    %151 = math.tanh %145 : vector<8x128xf32>
    %152 = vector.extract_strided_slice %150 {offsets = [0, 0], sizes = [8, 32], strides = [1, 1]} : vector<8x128xf32> to vector<8x32xf32>
    %153 = vector.extract_strided_slice %150 {offsets = [0, 32], sizes = [8, 32], strides = [1, 1]} : vector<8x128xf32> to vector<8x32xf32>
    %154 = vector.extract_strided_slice %151 {offsets = [0, 64], sizes = [8, 32], strides = [1, 1]} : vector<8x128xf32> to vector<8x32xf32>
    %155 = vector.extract_strided_slice %150 {offsets = [0, 96], sizes = [8, 32], strides = [1, 1]} : vector<8x128xf32> to vector<8x32xf32>
    %156 = arith.mulf %153, %136 : vector<8x32xf32>
    %157 = arith.mulf %152, %154 : vector<8x32xf32>
    %158 = arith.addf %156, %157 : vector<8x32xf32>
    %159 = math.tanh %158 : vector<8x32xf32>
    %160 = arith.mulf %155, %159 : vector<8x32xf32>
    %c6 = arith.constant 6 : index
    %c0_36 = arith.constant 0 : index
    %c0_37 = arith.constant 0 : index
    %161 = vector.load %arg10[%c6, %c0_36, %c0_37] : memref<8x8x32xf32, #tpu.memory_space<vmem>>, vector<1x8x32xf32>
    %162 = vector.shape_cast %161 : vector<1x8x32xf32> to vector<8x32xf32>
    %163 = vector.shape_cast %160 : vector<8x32xf32> to vector<1x8x32xf32>
    tpu.vector_store %arg10[%c6, %c0_36, %c0_37], %163 {strides = array<i32>} : memref<8x8x32xf32, #tpu.memory_space<vmem>>, vector<1x8x32xf32>,
    %164 = vector.extract_strided_slice %6 {offsets = [7, 0, 0], sizes = [1, 8, 128], strides = [1, 1, 1]} : vector<8x8x128xf32> to vector<1x8x128xf32>
    %165 = vector.shape_cast %164 : vector<1x8x128xf32> to vector<8x128xf32>
    %cst_38 = arith.constant dense<0.000000e+00> : vector<8x128xf32>
    %166 = tpu.matmul %160, %7, %cst_38 {dimension_numbers = #tpu.dot_dimension_numbers<[1], [0], [0], [1], [0, 0, 1, 1], [], []>} : vector<8x32xf32>, vector<32x128xf32>, vector<8x128xf32> -> vector<8x128xf32>
    %167 = arith.addf %165, %166 : vector<8x128xf32>
    %168 = arith.negf %167 : vector<8x128xf32>
    %169 = math.exp %168 : vector<8x128xf32>
    %cst_39 = arith.constant 1.000000e+00 : f32
    %170 = vector.broadcast %cst_39 : f32 to vector<8x128xf32>
    %171 = arith.addf %170, %169 : vector<8x128xf32>
    %172 = arith.divf %170, %171 : vector<8x128xf32>
    %173 = math.tanh %167 : vector<8x128xf32>
    %174 = vector.extract_strided_slice %172 {offsets = [0, 0], sizes = [8, 32], strides = [1, 1]} : vector<8x128xf32> to vector<8x32xf32>
    %175 = vector.extract_strided_slice %172 {offsets = [0, 32], sizes = [8, 32], strides = [1, 1]} : vector<8x128xf32> to vector<8x32xf32>
    %176 = vector.extract_strided_slice %173 {offsets = [0, 64], sizes = [8, 32], strides = [1, 1]} : vector<8x128xf32> to vector<8x32xf32>
    %177 = vector.extract_strided_slice %172 {offsets = [0, 96], sizes = [8, 32], strides = [1, 1]} : vector<8x128xf32> to vector<8x32xf32>
    %178 = arith.mulf %175, %158 : vector<8x32xf32>
    %179 = arith.mulf %174, %176 : vector<8x32xf32>
    %180 = arith.addf %178, %179 : vector<8x32xf32>
    %181 = math.tanh %180 : vector<8x32xf32>
    %182 = arith.mulf %177, %181 : vector<8x32xf32>
    %c7 = arith.constant 7 : index
    %c0_40 = arith.constant 0 : index
    %c0_41 = arith.constant 0 : index
    %183 = vector.load %arg10[%c7, %c0_40, %c0_41] : memref<8x8x32xf32, #tpu.memory_space<vmem>>, vector<1x8x32xf32>
    %184 = vector.shape_cast %183 : vector<1x8x32xf32> to vector<8x32xf32>
    %185 = vector.shape_cast %182 : vector<8x32xf32> to vector<1x8x32xf32>
    tpu.vector_store %arg10[%c7, %c0_40, %c0_41], %185 {strides = array<i32>} : memref<8x8x32xf32, #tpu.memory_space<vmem>>, vector<1x8x32xf32>,
    %c0_42 = arith.constant 0 : index
    %c0_43 = arith.constant 0 : index
    %c0_44 = arith.constant 0 : index
    %186 = vector.load %arg10[%c0_42, %c0_43, %c0_44] : memref<8x8x32xf32, #tpu.memory_space<vmem>>, vector<8x8x32xf32>
    %187 = vector.shape_cast %186 : vector<8x8x32xf32> to vector<64x32xf32>
    %c0_45 = arith.constant 0 : index
    %c0_46 = arith.constant 0 : index
    %188 = vector.load %arg4[%c0_45, %c0_46] : memref<32x128xf32, #tpu.memory_space<vmem>>, vector<32x128xf32>
    %cst_47 = arith.constant dense<0.000000e+00> : vector<64x128xf32>
    %189 = tpu.matmul %187, %188, %cst_47 {dimension_numbers = #tpu.dot_dimension_numbers<[1], [0], [0], [1], [0, 0, 1, 1], [], []>} : vector<64x32xf32>, vector<32x128xf32>, vector<64x128xf32> -> vector<64x128xf32>
    %c0_48 = arith.constant 0 : index
    %c0_49 = arith.constant 0 : index
    %190 = vector.load %arg6[%c0_48, %c0_49] : memref<1x128xf32, #tpu.memory_space<vmem>>, vector<1x128xf32>
    %191 = vector.broadcast %190 : vector<1x128xf32> to vector<64x128xf32>
    %192 = arith.addf %189, %191 : vector<64x128xf32>
    %193 = vector.shape_cast %192 : vector<64x128xf32> to vector<8x8x128xf32>
    %c0_50 = arith.constant 0 : index
    %c0_51 = arith.constant 0 : index
    %194 = vector.load %arg5[%c0_50, %c0_51] : memref<32x128xf32, #tpu.memory_space<vmem>>, vector<32x128xf32>
    %cst_52 = arith.constant 0.000000e+00 : f32
    %195 = vector.broadcast %cst_52 : f32 to vector<8x32xf32>
    %cst_53 = arith.constant 0.000000e+00 : f32
    %196 = vector.broadcast %cst_53 : f32 to vector<8x32xf32>
    %197 = vector.extract_strided_slice %193 {offsets = [0, 0, 0], sizes = [1, 8, 128], strides = [1, 1, 1]} : vector<8x8x128xf32> to vector<1x8x128xf32>
    %198 = vector.shape_cast %197 : vector<1x8x128xf32> to vector<8x128xf32>
    %cst_54 = arith.constant dense<0.000000e+00> : vector<8x128xf32>
    %199 = tpu.matmul %195, %194, %cst_54 {dimension_numbers = #tpu.dot_dimension_numbers<[1], [0], [0], [1], [0, 0, 1, 1], [], []>} : vector<8x32xf32>, vector<32x128xf32>, vector<8x128xf32> -> vector<8x128xf32>
    %200 = arith.addf %198, %199 : vector<8x128xf32>
    %201 = arith.negf %200 : vector<8x128xf32>
    %202 = math.exp %201 : vector<8x128xf32>
    %cst_55 = arith.constant 1.000000e+00 : f32
    %203 = vector.broadcast %cst_55 : f32 to vector<8x128xf32>
    %204 = arith.addf %203, %202 : vector<8x128xf32>
    %205 = arith.divf %203, %204 : vector<8x128xf32>
    %206 = math.tanh %200 : vector<8x128xf32>
    %207 = vector.extract_strided_slice %205 {offsets = [0, 0], sizes = [8, 32], strides = [1, 1]} : vector<8x128xf32> to vector<8x32xf32>
    %208 = vector.extract_strided_slice %205 {offsets = [0, 32], sizes = [8, 32], strides = [1, 1]} : vector<8x128xf32> to vector<8x32xf32>
    %209 = vector.extract_strided_slice %206 {offsets = [0, 64], sizes = [8, 32], strides = [1, 1]} : vector<8x128xf32> to vector<8x32xf32>
    %210 = vector.extract_strided_slice %205 {offsets = [0, 96], sizes = [8, 32], strides = [1, 1]} : vector<8x128xf32> to vector<8x32xf32>
    %211 = arith.mulf %208, %196 : vector<8x32xf32>
    %212 = arith.mulf %207, %209 : vector<8x32xf32>
    %213 = arith.addf %211, %212 : vector<8x32xf32>
    %214 = math.tanh %213 : vector<8x32xf32>
    %215 = arith.mulf %210, %214 : vector<8x32xf32>
    %216 = vector.extract_strided_slice %193 {offsets = [1, 0, 0], sizes = [1, 8, 128], strides = [1, 1, 1]} : vector<8x8x128xf32> to vector<1x8x128xf32>
    %217 = vector.shape_cast %216 : vector<1x8x128xf32> to vector<8x128xf32>
    %cst_56 = arith.constant dense<0.000000e+00> : vector<8x128xf32>
    %218 = tpu.matmul %215, %194, %cst_56 {dimension_numbers = #tpu.dot_dimension_numbers<[1], [0], [0], [1], [0, 0, 1, 1], [], []>} : vector<8x32xf32>, vector<32x128xf32>, vector<8x128xf32> -> vector<8x128xf32>
    %219 = arith.addf %217, %218 : vector<8x128xf32>
    %220 = arith.negf %219 : vector<8x128xf32>
    %221 = math.exp %220 : vector<8x128xf32>
    %cst_57 = arith.constant 1.000000e+00 : f32
    %222 = vector.broadcast %cst_57 : f32 to vector<8x128xf32>
    %223 = arith.addf %222, %221 : vector<8x128xf32>
    %224 = arith.divf %222, %223 : vector<8x128xf32>
    %225 = math.tanh %219 : vector<8x128xf32>
    %226 = vector.extract_strided_slice %224 {offsets = [0, 0], sizes = [8, 32], strides = [1, 1]} : vector<8x128xf32> to vector<8x32xf32>
    %227 = vector.extract_strided_slice %224 {offsets = [0, 32], sizes = [8, 32], strides = [1, 1]} : vector<8x128xf32> to vector<8x32xf32>
    %228 = vector.extract_strided_slice %225 {offsets = [0, 64], sizes = [8, 32], strides = [1, 1]} : vector<8x128xf32> to vector<8x32xf32>
    %229 = vector.extract_strided_slice %224 {offsets = [0, 96], sizes = [8, 32], strides = [1, 1]} : vector<8x128xf32> to vector<8x32xf32>
    %230 = arith.mulf %227, %213 : vector<8x32xf32>
    %231 = arith.mulf %226, %228 : vector<8x32xf32>
    %232 = arith.addf %230, %231 : vector<8x32xf32>
    %233 = math.tanh %232 : vector<8x32xf32>
    %234 = arith.mulf %229, %233 : vector<8x32xf32>
    %235 = vector.extract_strided_slice %193 {offsets = [2, 0, 0], sizes = [1, 8, 128], strides = [1, 1, 1]} : vector<8x8x128xf32> to vector<1x8x128xf32>
    %236 = vector.shape_cast %235 : vector<1x8x128xf32> to vector<8x128xf32>
    %cst_58 = arith.constant dense<0.000000e+00> : vector<8x128xf32>
    %237 = tpu.matmul %234, %194, %cst_58 {dimension_numbers = #tpu.dot_dimension_numbers<[1], [0], [0], [1], [0, 0, 1, 1], [], []>} : vector<8x32xf32>, vector<32x128xf32>, vector<8x128xf32> -> vector<8x128xf32>
    %238 = arith.addf %236, %237 : vector<8x128xf32>
    %239 = arith.negf %238 : vector<8x128xf32>
    %240 = math.exp %239 : vector<8x128xf32>
    %cst_59 = arith.constant 1.000000e+00 : f32
    %241 = vector.broadcast %cst_59 : f32 to vector<8x128xf32>
    %242 = arith.addf %241, %240 : vector<8x128xf32>
    %243 = arith.divf %241, %242 : vector<8x128xf32>
    %244 = math.tanh %238 : vector<8x128xf32>
    %245 = vector.extract_strided_slice %243 {offsets = [0, 0], sizes = [8, 32], strides = [1, 1]} : vector<8x128xf32> to vector<8x32xf32>
    %246 = vector.extract_strided_slice %243 {offsets = [0, 32], sizes = [8, 32], strides = [1, 1]} : vector<8x128xf32> to vector<8x32xf32>
    %247 = vector.extract_strided_slice %244 {offsets = [0, 64], sizes = [8, 32], strides = [1, 1]} : vector<8x128xf32> to vector<8x32xf32>
    %248 = vector.extract_strided_slice %243 {offsets = [0, 96], sizes = [8, 32], strides = [1, 1]} : vector<8x128xf32> to vector<8x32xf32>
    %249 = arith.mulf %246, %232 : vector<8x32xf32>
    %250 = arith.mulf %245, %247 : vector<8x32xf32>
    %251 = arith.addf %249, %250 : vector<8x32xf32>
    %252 = math.tanh %251 : vector<8x32xf32>
    %253 = arith.mulf %248, %252 : vector<8x32xf32>
    %254 = vector.extract_strided_slice %193 {offsets = [3, 0, 0], sizes = [1, 8, 128], strides = [1, 1, 1]} : vector<8x8x128xf32> to vector<1x8x128xf32>
    %255 = vector.shape_cast %254 : vector<1x8x128xf32> to vector<8x128xf32>
    %cst_60 = arith.constant dense<0.000000e+00> : vector<8x128xf32>
    %256 = tpu.matmul %253, %194, %cst_60 {dimension_numbers = #tpu.dot_dimension_numbers<[1], [0], [0], [1], [0, 0, 1, 1], [], []>} : vector<8x32xf32>, vector<32x128xf32>, vector<8x128xf32> -> vector<8x128xf32>
    %257 = arith.addf %255, %256 : vector<8x128xf32>
    %258 = arith.negf %257 : vector<8x128xf32>
    %259 = math.exp %258 : vector<8x128xf32>
    %cst_61 = arith.constant 1.000000e+00 : f32
    %260 = vector.broadcast %cst_61 : f32 to vector<8x128xf32>
    %261 = arith.addf %260, %259 : vector<8x128xf32>
    %262 = arith.divf %260, %261 : vector<8x128xf32>
    %263 = math.tanh %257 : vector<8x128xf32>
    %264 = vector.extract_strided_slice %262 {offsets = [0, 0], sizes = [8, 32], strides = [1, 1]} : vector<8x128xf32> to vector<8x32xf32>
    %265 = vector.extract_strided_slice %262 {offsets = [0, 32], sizes = [8, 32], strides = [1, 1]} : vector<8x128xf32> to vector<8x32xf32>
    %266 = vector.extract_strided_slice %263 {offsets = [0, 64], sizes = [8, 32], strides = [1, 1]} : vector<8x128xf32> to vector<8x32xf32>
    %267 = vector.extract_strided_slice %262 {offsets = [0, 96], sizes = [8, 32], strides = [1, 1]} : vector<8x128xf32> to vector<8x32xf32>
    %268 = arith.mulf %265, %251 : vector<8x32xf32>
    %269 = arith.mulf %264, %266 : vector<8x32xf32>
    %270 = arith.addf %268, %269 : vector<8x32xf32>
    %271 = math.tanh %270 : vector<8x32xf32>
    %272 = arith.mulf %267, %271 : vector<8x32xf32>
    %273 = vector.extract_strided_slice %193 {offsets = [4, 0, 0], sizes = [1, 8, 128], strides = [1, 1, 1]} : vector<8x8x128xf32> to vector<1x8x128xf32>
    %274 = vector.shape_cast %273 : vector<1x8x128xf32> to vector<8x128xf32>
    %cst_62 = arith.constant dense<0.000000e+00> : vector<8x128xf32>
    %275 = tpu.matmul %272, %194, %cst_62 {dimension_numbers = #tpu.dot_dimension_numbers<[1], [0], [0], [1], [0, 0, 1, 1], [], []>} : vector<8x32xf32>, vector<32x128xf32>, vector<8x128xf32> -> vector<8x128xf32>
    %276 = arith.addf %274, %275 : vector<8x128xf32>
    %277 = arith.negf %276 : vector<8x128xf32>
    %278 = math.exp %277 : vector<8x128xf32>
    %cst_63 = arith.constant 1.000000e+00 : f32
    %279 = vector.broadcast %cst_63 : f32 to vector<8x128xf32>
    %280 = arith.addf %279, %278 : vector<8x128xf32>
    %281 = arith.divf %279, %280 : vector<8x128xf32>
    %282 = math.tanh %276 : vector<8x128xf32>
    %283 = vector.extract_strided_slice %281 {offsets = [0, 0], sizes = [8, 32], strides = [1, 1]} : vector<8x128xf32> to vector<8x32xf32>
    %284 = vector.extract_strided_slice %281 {offsets = [0, 32], sizes = [8, 32], strides = [1, 1]} : vector<8x128xf32> to vector<8x32xf32>
    %285 = vector.extract_strided_slice %282 {offsets = [0, 64], sizes = [8, 32], strides = [1, 1]} : vector<8x128xf32> to vector<8x32xf32>
    %286 = vector.extract_strided_slice %281 {offsets = [0, 96], sizes = [8, 32], strides = [1, 1]} : vector<8x128xf32> to vector<8x32xf32>
    %287 = arith.mulf %284, %270 : vector<8x32xf32>
    %288 = arith.mulf %283, %285 : vector<8x32xf32>
    %289 = arith.addf %287, %288 : vector<8x32xf32>
    %290 = math.tanh %289 : vector<8x32xf32>
    %291 = arith.mulf %286, %290 : vector<8x32xf32>
    %292 = vector.extract_strided_slice %193 {offsets = [5, 0, 0], sizes = [1, 8, 128], strides = [1, 1, 1]} : vector<8x8x128xf32> to vector<1x8x128xf32>
    %293 = vector.shape_cast %292 : vector<1x8x128xf32> to vector<8x128xf32>
    %cst_64 = arith.constant dense<0.000000e+00> : vector<8x128xf32>
    %294 = tpu.matmul %291, %194, %cst_64 {dimension_numbers = #tpu.dot_dimension_numbers<[1], [0], [0], [1], [0, 0, 1, 1], [], []>} : vector<8x32xf32>, vector<32x128xf32>, vector<8x128xf32> -> vector<8x128xf32>
    %295 = arith.addf %293, %294 : vector<8x128xf32>
    %296 = arith.negf %295 : vector<8x128xf32>
    %297 = math.exp %296 : vector<8x128xf32>
    %cst_65 = arith.constant 1.000000e+00 : f32
    %298 = vector.broadcast %cst_65 : f32 to vector<8x128xf32>
    %299 = arith.addf %298, %297 : vector<8x128xf32>
    %300 = arith.divf %298, %299 : vector<8x128xf32>
    %301 = math.tanh %295 : vector<8x128xf32>
    %302 = vector.extract_strided_slice %300 {offsets = [0, 0], sizes = [8, 32], strides = [1, 1]} : vector<8x128xf32> to vector<8x32xf32>
    %303 = vector.extract_strided_slice %300 {offsets = [0, 32], sizes = [8, 32], strides = [1, 1]} : vector<8x128xf32> to vector<8x32xf32>
    %304 = vector.extract_strided_slice %301 {offsets = [0, 64], sizes = [8, 32], strides = [1, 1]} : vector<8x128xf32> to vector<8x32xf32>
    %305 = vector.extract_strided_slice %300 {offsets = [0, 96], sizes = [8, 32], strides = [1, 1]} : vector<8x128xf32> to vector<8x32xf32>
    %306 = arith.mulf %303, %289 : vector<8x32xf32>
    %307 = arith.mulf %302, %304 : vector<8x32xf32>
    %308 = arith.addf %306, %307 : vector<8x32xf32>
    %309 = math.tanh %308 : vector<8x32xf32>
    %310 = arith.mulf %305, %309 : vector<8x32xf32>
    %311 = vector.extract_strided_slice %193 {offsets = [6, 0, 0], sizes = [1, 8, 128], strides = [1, 1, 1]} : vector<8x8x128xf32> to vector<1x8x128xf32>
    %312 = vector.shape_cast %311 : vector<1x8x128xf32> to vector<8x128xf32>
    %cst_66 = arith.constant dense<0.000000e+00> : vector<8x128xf32>
    %313 = tpu.matmul %310, %194, %cst_66 {dimension_numbers = #tpu.dot_dimension_numbers<[1], [0], [0], [1], [0, 0, 1, 1], [], []>} : vector<8x32xf32>, vector<32x128xf32>, vector<8x128xf32> -> vector<8x128xf32>
    %314 = arith.addf %312, %313 : vector<8x128xf32>
    %315 = arith.negf %314 : vector<8x128xf32>
    %316 = math.exp %315 : vector<8x128xf32>
    %cst_67 = arith.constant 1.000000e+00 : f32
    %317 = vector.broadcast %cst_67 : f32 to vector<8x128xf32>
    %318 = arith.addf %317, %316 : vector<8x128xf32>
    %319 = arith.divf %317, %318 : vector<8x128xf32>
    %320 = math.tanh %314 : vector<8x128xf32>
    %321 = vector.extract_strided_slice %319 {offsets = [0, 0], sizes = [8, 32], strides = [1, 1]} : vector<8x128xf32> to vector<8x32xf32>
    %322 = vector.extract_strided_slice %319 {offsets = [0, 32], sizes = [8, 32], strides = [1, 1]} : vector<8x128xf32> to vector<8x32xf32>
    %323 = vector.extract_strided_slice %320 {offsets = [0, 64], sizes = [8, 32], strides = [1, 1]} : vector<8x128xf32> to vector<8x32xf32>
    %324 = vector.extract_strided_slice %319 {offsets = [0, 96], sizes = [8, 32], strides = [1, 1]} : vector<8x128xf32> to vector<8x32xf32>
    %325 = arith.mulf %322, %308 : vector<8x32xf32>
    %326 = arith.mulf %321, %323 : vector<8x32xf32>
    %327 = arith.addf %325, %326 : vector<8x32xf32>
    %328 = math.tanh %327 : vector<8x32xf32>
    %329 = arith.mulf %324, %328 : vector<8x32xf32>
    %330 = vector.extract_strided_slice %193 {offsets = [7, 0, 0], sizes = [1, 8, 128], strides = [1, 1, 1]} : vector<8x8x128xf32> to vector<1x8x128xf32>
    %331 = vector.shape_cast %330 : vector<1x8x128xf32> to vector<8x128xf32>
    %cst_68 = arith.constant dense<0.000000e+00> : vector<8x128xf32>
    %332 = tpu.matmul %329, %194, %cst_68 {dimension_numbers = #tpu.dot_dimension_numbers<[1], [0], [0], [1], [0, 0, 1, 1], [], []>} : vector<8x32xf32>, vector<32x128xf32>, vector<8x128xf32> -> vector<8x128xf32>
    %333 = arith.addf %331, %332 : vector<8x128xf32>
    %334 = arith.negf %333 : vector<8x128xf32>
    %335 = math.exp %334 : vector<8x128xf32>
    %cst_69 = arith.constant 1.000000e+00 : f32
    %336 = vector.broadcast %cst_69 : f32 to vector<8x128xf32>
    %337 = arith.addf %336, %335 : vector<8x128xf32>
    %338 = arith.divf %336, %337 : vector<8x128xf32>
    %339 = math.tanh %333 : vector<8x128xf32>
    %340 = vector.extract_strided_slice %338 {offsets = [0, 0], sizes = [8, 32], strides = [1, 1]} : vector<8x128xf32> to vector<8x32xf32>
    %341 = vector.extract_strided_slice %338 {offsets = [0, 32], sizes = [8, 32], strides = [1, 1]} : vector<8x128xf32> to vector<8x32xf32>
    %342 = vector.extract_strided_slice %339 {offsets = [0, 64], sizes = [8, 32], strides = [1, 1]} : vector<8x128xf32> to vector<8x32xf32>
    %343 = vector.extract_strided_slice %338 {offsets = [0, 96], sizes = [8, 32], strides = [1, 1]} : vector<8x128xf32> to vector<8x32xf32>
    %344 = arith.mulf %341, %327 : vector<8x32xf32>
    %345 = arith.mulf %340, %342 : vector<8x32xf32>
    %346 = arith.addf %344, %345 : vector<8x32xf32>
    %347 = math.tanh %346 : vector<8x32xf32>
    %348 = arith.mulf %343, %347 : vector<8x32xf32>
    %c0_70 = arith.constant 0 : index
    %c0_71 = arith.constant 0 : index
    %349 = vector.load %arg7[%c0_70, %c0_71] : memref<1x32xf32, #tpu.memory_space<vmem>>, vector<1x32xf32>
    %350 = vector.broadcast %349 : vector<1x32xf32> to vector<8x32xf32>
    %351 = arith.mulf %348, %350 : vector<8x32xf32>
    %cst_72 = arith.constant dense<0.000000e+00> : vector<8xf32>
    %352 = vector.multi_reduction <add>, %351, %cst_72 [1] : vector<8x32xf32> to vector<8xf32>
    %353 = vector.shape_cast %352 : vector<8xf32> to vector<8x1xf32>
    %c0_73 = arith.constant 0 : index
    %c0_74 = arith.constant 0 : index
    %354 = vector.load %arg8[%c0_73, %c0_74] : memref<1x1xf32, #tpu.memory_space<vmem>>, vector<1x1xf32>
    %355 = vector.broadcast %354 : vector<1x1xf32> to vector<8x1xf32>
    %356 = arith.addf %353, %355 : vector<8x1xf32>
    %c0_75 = arith.constant 0 : index
    %c0_76 = arith.constant 0 : index
    %357 = vector.load %arg9[%c0_75, %c0_76] : memref<8x1xf32, #tpu.memory_space<vmem>>, vector<8x1xf32>
    tpu.vector_store %arg9[%c0_75, %c0_76], %356 {strides = array<i32>} : memref<8x1xf32, #tpu.memory_space<vmem>>, vector<8x1xf32>,
    return
  }
}

</mosaic_0001>

<bundles_post_ra>
// kernel: tpu_custom_call.1
= control target key start
LH: loop header
LB: loop body
LE: loop exit
PB: predicated region body
PF: predicated region fallthrough
CT: control target
= control target key end

     0   :  { %s2985_s0 = inlined_call_operand.vmem [shape: f32[64,4], index: 0, kind: input, shape index: {}]   ;;  %s2986_s1 = inlined_call_operand.vmem [shape: f32[4,128], index: 1, kind: input, shape index: {}]   ;;  %s2987_s2 = inlined_call_operand.vmem [shape: f32[32,128], index: 2, kind: input, shape index: {}]   ;;  %s2988_s3 = inlined_call_operand.vmem [shape: f32[1,128], index: 3, kind: input, shape index: {}]   ;;  %s2989_s4 = inlined_call_operand.vmem [shape: f32[32,128], index: 4, kind: input, shape index: {}]   ;;  %s2990_s5 = inlined_call_operand.hbm [shape: f32[32,128], index: 5, kind: input, shape index: {}]   ;;  %s2991_s6 = inlined_call_operand.vmem [shape: f32[1,128], index: 6, kind: input, shape index: {}]   ;;  %s2992_s7 = inlined_call_operand.vmem [shape: f32[1,32], index: 7, kind: input, shape index: {}]   ;;  %s2993_s8 = inlined_call_operand.<no memory space> [shape: f32[1,1], index: 8, kind: input, shape index: {}]   ;;  %s2994_s9 = inlined_call_operand.vmem [shape: f32[8,1], index: 9, kind: output, shape index: {}]  }
   0x1   :  { %v14_v0 = vstv %s2993_s8 }
   0x2   :  { %15 = vst [vmem:[#allocation3] sm:$0x1] %v14_v0 }
   0x3   :  { %16 = vsyncpa [#allocation5], 0  ;;  %s2526_s11 = smov [#allocation4]  }
   0x4   :  { %s32_s12 = sshll.u32 %s2526_s11, 4  ;;  %s33_s12 = int_to_ptr.vmem [resolvable:$true] %s32_s12 }
   0x5   :  { %s2512_s13 = scalar_lea.vmem %s33_s12, 512  ;;  %p2517_p1 = scmp.lt.s32.totalorder %s33_s12, %s33_s12 }
   0x6   :  { %p2513_p0 = scmp.ne.s32.totalorder %s33_s12, %s2512_s13  ;;  %p2518_p2 = scmp.lt.s32.totalorder %s2512_s13, %s2512_s13 }
   0x8   :  { %p2519_p3 = por %p2518_p2, %p2517_p1 }
   0xa   :  { %p2520_p4 = pnand %p2519_p3, %p2513_p0 }
   0xc   :  { %2523 = shalt.err (!%p2520_p4)
}
   0xd   :  { %s2527_s14 = smov 128   ;;  %s2528_s15 = smov 8  }
   0xe   :  { %38 = dma.hbm_to_vmem [thread:$0]  %s2990_s5, 512, %s33_s12, [#allocation5], %s2527_s14, %s2527_s14, %s2528_s15  }
   0xf   :  { %2524 = dma.done.wait [#allocation5], 512  }
  0x10   :  { %2525 = vsyncadd [#allocation5], 4294966784  ;;  %v2529_v1 = vmov 0.0   ;;  %vm2530_vm0 = vmmov 0   ;;  %vm89_vm1 = vcmask 1043456   ;;  %vm64_vm2 = vcmask 31744  }
  0x11   :  { %2172 = vmatprep.subr.mxu1 %v2529_v1  ;;  %2180 = vmatprep.mubr.msk.f32.mxu1 %vm2530_vm0, %v2529_v1  ;;  %v56_v2 = vld [vmem:[%s2986_s1] sm:$0xf]  ;;  %v2599_v3 = vld [vmem:[%s2987_s2 + $0x18] sm:$0xff]  ;;  %v49_v5 = vld [vmem:[%s2985_s0 + $0x8] sm:$0xff]  ;;  %s2531_s30 = smov 64   ;;  %vm202_vm3 = vcmask 261120  }
  0x12   :  { %v48_v4 = vld [vmem:[%s2985_s0] sm:$0xff]  ;;  %2158 = vmatprep.subr.msk.mxu0 %vm89_vm1, %v56_v2  ;;  %2173 = vmatpush3.msra.mxu1 %v2599_v3  ;;  %v2611_v6 = vld [vmem:[%s2987_s2 + $0x10] sm:$0xff]  ;;  %v2619_v7 = vld [vmem:[%s2987_s2 + $0x8] sm:$0xff]  ;;  %s2533_s28 = smov 96   ;;  %vm1999_vm4 = vcmask 7168  }
  0x13   :  { %2159 = vmatpush3.msk.msra.mxu0 %vm89_vm1, %v56_v2  ;;  %2160 = vmatprep.mubr.msk.f32.mxu0 %vm64_vm2, %v48_v4  ;;  %v2627_v8 = vld [vmem:[%s2987_s2] sm:$0xff]  ;;  %v50_v44 = vld [vmem:[%s2985_s0 + $0x10] sm:$0xff]  ;;  %v51_v45 = vld [vmem:[%s2985_s0 + $0x18] sm:$0xff] }
  0x14   :  { %2174 = vmatprep.subr.mxu1 %v2529_v1  ;;  %2161 = vmatmul.mubr.msk.f32.vlgmr.msra.gmra.mxu0 %vm64_vm2, %v49_v5  ;;  %v2655_v10 = vld [vmem:[%s2988_s3] ss:$0 sm:$0xff]  ;;  %s2532_s3 = smov 32   ;;  %v53_v47 = vld [vmem:[%s2985_s0 + $0x28] sm:$0xff]  ;;  %v54_v48 = vld [vmem:[%s2985_s0 + $0x30] sm:$0xff] }
  0x15   :  { %2175 = vmatpush3.msra.mxu1 %v2611_v6  ;;  %2194 = vmatprep.subr.mxu0 %v2529_v1  ;;  %v52_v46 = vld [vmem:[%s2985_s0 + $0x20] sm:$0xff]  ;;  %v55_v49 = vld [vmem:[%s2985_s0 + $0x38] sm:$0xff] }
  0x16   :  { %2176 = vmatprep.subr.mxu1 %v2529_v1  ;;  %2195 = vmatpush3.msra.mxu0 %v2599_v3 }
  0x17   :  { %2177 = vmatpush3.msra.mxu1 %v2619_v7  ;;  %2196 = vmatprep.subr.mxu0 %v2529_v1 }
  0x18   :  { %2178 = vmatprep.subr.mxu1 %v2529_v1  ;;  %2197 = vmatpush3.msra.mxu0 %v2611_v6 }
  0x19   :  { %2179 = vmatpush3.msra.mxu1 %v2627_v8  ;;  %2198 = vmatprep.subr.mxu0 %v2529_v1 }
  0x1a   :  { %2181 = vmatmul.mubr.f32.vlgmr.msra.gmra.mxu1 %v2529_v1  ;;  %2183 = vmatprep.subr.mxu1 %v2529_v1 }
  0x1b   :  { %2184 = vmatpush3.msra.mxu1 %v2599_v3  ;;  %2191 = vmatprep.mubr.msk.f32.mxu1 %vm2530_vm0, %v2529_v1 }
  0x1c   :  { %2185 = vmatprep.subr.mxu1 %v2529_v1  ;;  %2199 = vmatpush3.msra.mxu0 %v2619_v7 }
  0x1d   :  { %2186 = vmatpush3.msra.mxu1 %v2611_v6  ;;  %2200 = vmatprep.subr.mxu0 %v2529_v1 }
  0x1e   :  { %2187 = vmatprep.subr.mxu1 %v2529_v1  ;;  %2201 = vmatpush3.msra.mxu0 %v2627_v8 }
  0x1f   :  { %2188 = vmatpush3.msra.mxu1 %v2619_v7  ;;  %2216 = vmatprep.subr.mxu0 %v2529_v1 }
  0x20   :  { %2189 = vmatprep.subr.mxu1 %v2529_v1  ;;  %2163 = vmatprep.mubr.msk.f32.mxu0 %vm64_vm2, %v50_v44 }
  0x21   :  { %2190 = vmatpush3.msra.mxu1 %v2627_v8  ;;  %2164 = vmatmul.mubr.msk.f32.gmra.mxu0 %vm64_vm2, %v51_v45 }
  0x22   :  { %2205 = vmatprep.subr.mxu1 %v2529_v1  ;;  %2166 = vmatprep.mubr.msk.f32.mxu0 %vm64_vm2, %v52_v46 }
  0x25   :  { %2167 = vmatmul.mubr.msk.f32.gmra.mxu0 %vm64_vm2, %v53_v47 }
  0x26   :  { %2169 = vmatprep.mubr.msk.f32.mxu0 %vm64_vm2, %v54_v48 }
  0x29   :  { %2170 = vmatmul.mubr.msk.f32.gmra.mxu0 %vm64_vm2, %v55_v49 }
  0x2a   :  { %2202 = vmatprep.mubr.msk.f32.mxu0 %vm2530_vm0, %v2529_v1 }
  0xd4   :  { %v2162_v9 = vpop.f32.mrf.mxu0 }
  0xd5   :  { %v165_v30 = vadd.f32 %v2162_v9, %v2655_v10 }
  0xd6   :  { %v159_v11 = vpop.f32.mrf.mxu0 }
  0xd7   :  { %v160_v12 = vadd.f32 %v2655_v10, %v159_v11 }
  0xda   :  { %v272_v13 = vpop.f32.mrf.mxu1 }
  0xdb   :  { %v276_v14 = vadd.f32 %v272_v13, %v160_v12 }
  0xdc   :  { %v2182_v15 = vpop.f32.mrf.mxu1 }
  0xdd   :  { %2376 = vtanh.f32 %v276_v14  ;;  %v2016_v17 = vmul.f32 -1.442695, %v276_v14 }
  0xdf   :  { %2378 = vpow2.f32 %v2016_v17 }
  0xe1   :  { %v2165_v54 = vpop.f32.mrf.mxu0 }
  0xe3   :  { %v169_v55 = vpop.f32.mrf.mxu0 }
  0xe4   :  { %v170_v60 = vadd.f32 %v2655_v10, %v169_v55 }
  0xe5   :  { %v2717_v56 = vpop.f32.mrf.mxu0 }
  0xe7   :  { %v2719_v57 = vpop.f32.mrf.mxu0 }
  0xe9   :  { %v2721_v58 = vpop.f32.mrf.mxu0 }
  0xea   :  { %v2377_v16 = vpop.eup %2376 }
  0xeb   :  { %286 = vrot.lane.b32.xlu0 %v2377_v16, %s2531_s30  ;;  %v2723_v59 = vpop.f32.mrf.mxu0 }
  0xec   :  { %v2379_v18 = vpop.eup %2378 }
  0xed   :  { %v280_v19 = vadd.f32 1.0, %v2379_v18 }
  0xef   :  { %2380 = vrcp.f32 %v280_v19 }
  0xfc   :  { %v2381_v20 = vpop.eup %2380 }
  0xfd   :  { %v284_v23 = vmul.f32 0.0, %v2381_v20 }
 0x15d   :  { %v287_v21 = vpop.permute.xlu0 %286 }
 0x15e   :  { %v289_v22 = vmul.f32 %v2381_v20, %v287_v21 }
 0x160   :  { %291 = vrot.lane.b32.xlu0 %v289_v22, %s2532_s3 }
 0x1d2   :  { %v292_v24 = vpop.permute.xlu0 %291 }
 0x1d3   :  { %v294_v25 = vadd.f32 %v292_v24, %v284_v23 }
 0x1d5   :  { %2382 = vtanh.f32 %v294_v25 }
 0x1e2   :  { %v2383_v26 = vpop.eup %2382 }
 0x1e3   :  { %297 = vrot.lane.b32.xlu1 %v2383_v26, %s2531_s30 }
 0x255   :  { %v298_v27 = vpop.permute.xlu1 %297 }
 0x256   :  { %v300_v28 = vmul.f32 %v2381_v20, %v298_v27  ;;  %v175_v20 = vadd.f32 %v2165_v54, %v2655_v10 }
 0x258   :  { %302 = vrot.lane.b32.xlu1 %v300_v28, %s2532_s3 }
 0x2ca   :  { %v303_v29 = vpop.permute.xlu1 %302 }
 0x2cb   :  { %305 = vst.msk [vmem:[#allocation2] sm:$0xff] %vm202_vm3, %v303_v29  ;;  %2192 = vmatmul.mubr.msk.f32.vlgmr.msra.gmra.mxu1 %vm202_vm3, %v303_v29 }
 0x2cc   :  { %2206 = vmatpush3.msra.mxu1 %v2599_v3  ;;  %2213 = vmatprep.mubr.msk.f32.mxu1 %vm2530_vm0, %v2529_v1 }
 0x2cd   :  { %2207 = vmatprep.subr.mxu1 %v2529_v1 }
 0x2ce   :  { %2208 = vmatpush3.msra.mxu1 %v2611_v6 }
 0x2cf   :  { %2209 = vmatprep.subr.mxu1 %v2529_v1 }
 0x2d0   :  { %2210 = vmatpush3.msra.mxu1 %v2619_v7 }
 0x2d1   :  { %2211 = vmatprep.subr.mxu1 %v2529_v1 }
 0x2d2   :  { %2212 = vmatpush3.msra.mxu1 %v2627_v8 }
 0x2d3   :  { %2227 = vmatprep.subr.mxu1 %v2529_v1 }
 0x38b   :  { %v374_v31 = vpop.f32.mrf.mxu1 }
 0x38c   :  { %v378_v32 = vadd.f32 %v374_v31, %v165_v30 }
 0x38d   :  { %v2193_v33 = vpop.f32.mrf.mxu1 }
 0x38e   :  { %2384 = vtanh.f32 %v378_v32  ;;  %v2018_v35 = vmul.f32 -1.442695, %v378_v32 }
 0x390   :  { %2386 = vpow2.f32 %v2018_v35 }
 0x39b   :  { %v2385_v34 = vpop.eup %2384 }
 0x39c   :  { %388 = vrot.lane.b32.xlu0 %v2385_v34, %s2531_s30 }
 0x39d   :  { %v2387_v36 = vpop.eup %2386 }
 0x39e   :  { %v382_v37 = vadd.f32 1.0, %v2387_v36 }
 0x3a0   :  { %2388 = vrcp.f32 %v382_v37 }
 0x3ad   :  { %v2389_v38 = vpop.eup %2388 }
 0x3ae   :  { %v386_v41 = vmul.f32 %v2389_v38, %v294_v25 }
 0x40e   :  { %v389_v39 = vpop.permute.xlu0 %388 }
 0x40f   :  { %v391_v40 = vmul.f32 %v2389_v38, %v389_v39 }
 0x411   :  { %393 = vrot.lane.b32.xlu1 %v391_v40, %s2532_s3 }
 0x483   :  { %v394_v42 = vpop.permute.xlu1 %393 }
 0x484   :  { %v396_v43 = vadd.f32 %v394_v42, %v386_v41 }
 0x486   :  { %2390 = vtanh.f32 %v396_v43 }
 0x493   :  { %v2391_v50 = vpop.eup %2390 }
 0x494   :  { %399 = vrot.lane.b32.xlu0 %v2391_v50, %s2531_s30 }
 0x506   :  { %v400_v51 = vpop.permute.xlu0 %399 }
 0x507   :  { %v402_v52 = vmul.f32 %v2389_v38, %v400_v51  ;;  %v180_v38 = vadd.f32 %v2655_v10, %v2719_v57 }
 0x509   :  { %404 = vrot.lane.b32.xlu1 %v402_v52, %s2532_s3 }
 0x57b   :  { %v405_v53 = vpop.permute.xlu1 %404 }
 0x57c   :  { %408 = vst.msk [vmem:[#allocation2 + $0x8] sm:$0xff] %vm202_vm3, %v405_v53  ;;  %2203 = vmatmul.mubr.msk.f32.vlgmr.msra.gmra.mxu0 %vm202_vm3, %v405_v53 }
 0x57d   :  { %2217 = vmatpush3.msra.mxu0 %v2599_v3  ;;  %2224 = vmatprep.mubr.msk.f32.mxu0 %vm2530_vm0, %v2529_v1 }
 0x57e   :  { %2218 = vmatprep.subr.mxu0 %v2529_v1 }
 0x57f   :  { %2219 = vmatpush3.msra.mxu0 %v2611_v6 }
 0x580   :  { %2220 = vmatprep.subr.mxu0 %v2529_v1 }
 0x581   :  { %2221 = vmatpush3.msra.mxu0 %v2619_v7 }
 0x582   :  { %2222 = vmatprep.subr.mxu0 %v2529_v1 }
 0x583   :  { %2223 = vmatpush3.msra.mxu0 %v2627_v8 }
 0x584   :  { %2238 = vmatprep.subr.mxu0 %v2529_v1 }
 0x63c   :  { %v477_v61 = vpop.f32.mrf.mxu0 }
 0x63d   :  { %v481_v62 = vadd.f32 %v477_v61, %v170_v60 }
 0x63e   :  { %v2204_v63 = vpop.f32.mrf.mxu0 }
 0x63f   :  { %2392 = vtanh.f32 %v481_v62  ;;  %v2020_v2 = vmul.f32 -1.442695, %v481_v62 }
 0x641   :  { %2394 = vpow2.f32 %v2020_v2 }
 0x64c   :  { %v2393_v0 = vpop.eup %2392 }
 0x64d   :  { %491 = vrot.lane.b32.xlu0 %v2393_v0, %s2531_s30 }
 0x64e   :  { %v2395_v4 = vpop.eup %2394 }
 0x64f   :  { %v485_v5 = vadd.f32 1.0, %v2395_v4 }
 0x651   :  { %2396 = vrcp.f32 %v485_v5 }
 0x65e   :  { %v2397_v9 = vpop.eup %2396 }
 0x65f   :  { %v489_v13 = vmul.f32 %v2397_v9, %v396_v43 }
 0x6bf   :  { %v492_v11 = vpop.permute.xlu0 %491 }
 0x6c0   :  { %v494_v12 = vmul.f32 %v2397_v9, %v492_v11 }
 0x6c2   :  { %496 = vrot.lane.b32.xlu1 %v494_v12, %s2532_s3 }
 0x734   :  { %v497_v14 = vpop.permute.xlu1 %496 }
 0x735   :  { %v499_v15 = vadd.f32 %v497_v14, %v489_v13 }
 0x737   :  { %2398 = vtanh.f32 %v499_v15 }
 0x744   :  { %v2399_v16 = vpop.eup %2398 }
 0x745   :  { %502 = vrot.lane.b32.xlu0 %v2399_v16, %s2531_s30  ;;  %v1027_v16 = vld [vmem:[#allocation2] sm:$0xff] }
 0x7b7   :  { %v503_v17 = vpop.permute.xlu0 %502 }
 0x7b8   :  { %v505_v18 = vmul.f32 %v2397_v9, %v503_v17  ;;  %v1038_v9 = vld [vmem:[%s2989_s4 + $0x18] sm:$0xff]  ;;  %v1036_v17 = vld [vmem:[%s2989_s4 + $0x8] sm:$0xff] }
 0x7ba   :  { %507 = vrot.lane.b32.xlu1 %v505_v18, %s2532_s3  ;;  %v1035_v18 = vld [vmem:[%s2989_s4] sm:$0xff] }
 0x82c   :  { %v508_v19 = vpop.permute.xlu1 %507 }
 0x82d   :  { %511 = vst.msk [vmem:[#allocation2 + $0x10] sm:$0xff] %vm202_vm3, %v508_v19  ;;  %2214 = vmatmul.mubr.msk.f32.vlgmr.msra.gmra.mxu1 %vm202_vm3, %v508_v19  ;;  %v1028_v19 = vld [vmem:[#allocation2 + $0x8] sm:$0xff] }
 0x82e   :  { %2228 = vmatpush3.msra.mxu1 %v2599_v3  ;;  %2235 = vmatprep.mubr.msk.f32.mxu1 %vm2530_vm0, %v2529_v1 }
 0x82f   :  { %2229 = vmatprep.subr.mxu1 %v2529_v1 }
 0x830   :  { %2230 = vmatpush3.msra.mxu1 %v2611_v6 }
 0x831   :  { %2231 = vmatprep.subr.mxu1 %v2529_v1 }
 0x832   :  { %2232 = vmatpush3.msra.mxu1 %v2619_v7 }
 0x833   :  { %2233 = vmatprep.subr.mxu1 %v2529_v1 }
 0x834   :  { %2234 = vmatpush3.msra.mxu1 %v2627_v8 }
 0x835   :  { %2249 = vmatprep.subr.mxu1 %v2529_v1 }
 0x8ed   :  { %v580_v21 = vpop.f32.mrf.mxu1 }
 0x8ee   :  { %v584_v22 = vadd.f32 %v580_v21, %v175_v20  ;;  %v1029_v20 = vld [vmem:[#allocation2 + $0x10] sm:$0xff] }
 0x8ef   :  { %v2215_v23 = vpop.f32.mrf.mxu1 }
 0x8f0   :  { %2400 = vtanh.f32 %v584_v22  ;;  %v2022_v25 = vmul.f32 -1.442695, %v584_v22 }
 0x8f2   :  { %2402 = vpow2.f32 %v2022_v25 }
 0x8fd   :  { %v2401_v24 = vpop.eup %2400 }
 0x8fe   :  { %594 = vrot.lane.b32.xlu0 %v2401_v24, %s2531_s30  ;;  %v190_v24 = vadd.f32 %v2655_v10, %v2723_v59 }
 0x8ff   :  { %v2403_v26 = vpop.eup %2402 }
 0x900   :  { %v588_v27 = vadd.f32 1.0, %v2403_v26 }
 0x902   :  { %2404 = vrcp.f32 %v588_v27 }
 0x90f   :  { %v2405_v28 = vpop.eup %2404 }
 0x910   :  { %v592_v31 = vmul.f32 %v2405_v28, %v499_v15  ;;  %v1037_v15 = vld [vmem:[%s2989_s4 + $0x10] sm:$0xff] }
 0x970   :  { %v595_v29 = vpop.permute.xlu0 %594 }
 0x971   :  { %v597_v30 = vmul.f32 %v2405_v28, %v595_v29 }
 0x973   :  { %599 = vrot.lane.b32.xlu1 %v597_v30, %s2532_s3 }
 0x9e5   :  { %v600_v32 = vpop.permute.xlu1 %599 }
 0x9e6   :  { %v602_v33 = vadd.f32 %v600_v32, %v592_v31 }
 0x9e8   :  { %2406 = vtanh.f32 %v602_v33 }
 0x9f5   :  { %v2407_v34 = vpop.eup %2406 }
 0x9f6   :  { %605 = vrot.lane.b32.xlu0 %v2407_v34, %s2531_s30 }
 0xa68   :  { %v606_v35 = vpop.permute.xlu0 %605 }
 0xa69   :  { %v608_v36 = vmul.f32 %v2405_v28, %v606_v35 }
 0xa6b   :  { %610 = vrot.lane.b32.xlu1 %v608_v36, %s2532_s3 }
 0xadd   :  { %v611_v37 = vpop.permute.xlu1 %610 }
 0xade   :  { %614 = vst.msk [vmem:[#allocation2 + $0x18] sm:$0xff] %vm202_vm3, %v611_v37  ;;  %2225 = vmatmul.mubr.msk.f32.vlgmr.msra.gmra.mxu0 %vm202_vm3, %v611_v37 }
 0xadf   :  { %2239 = vmatpush3.msra.mxu0 %v2599_v3  ;;  %2246 = vmatprep.mubr.msk.f32.mxu0 %vm2530_vm0, %v2529_v1 }
 0xae0   :  { %2240 = vmatprep.subr.mxu0 %v2529_v1 }
 0xae1   :  { %2241 = vmatpush3.msra.mxu0 %v2611_v6 }
 0xae2   :  { %2242 = vmatprep.subr.mxu0 %v2529_v1 }
 0xae3   :  { %2243 = vmatpush3.msra.mxu0 %v2619_v7 }
 0xae4   :  { %2244 = vmatprep.subr.mxu0 %v2529_v1 }
 0xae5   :  { %2245 = vmatpush3.msra.mxu0 %v2627_v8  ;;  %v1030_v21 = vld [vmem:[#allocation2 + $0x18] sm:$0xff] }
 0xae6   :  { %2260 = vmatprep.subr.mxu0 %v1038_v9 }
 0xb9e   :  { %v683_v39 = vpop.f32.mrf.mxu0 }
 0xb9f   :  { %v687_v40 = vadd.f32 %v683_v39, %v180_v38  ;;  %v2811_v38 = vld [vmem:[#allocation4 + $0x18] sm:$0xff]  ;;  %v2814_v39 = vld [vmem:[#allocation4 + $0x10] sm:$0xff] }
 0xba0   :  { %v2226_v41 = vpop.f32.mrf.mxu0 }
 0xba1   :  { %2408 = vtanh.f32 %v687_v40  ;;  %v2024_v43 = vmul.f32 -1.442695, %v687_v40  ;;  %v2818_v40 = vld [vmem:[#allocation4 + $0x8] sm:$0xff]  ;;  %v2822_v41 = vld [vmem:[#allocation4] sm:$0xff] }
 0xba3   :  { %2410 = vpow2.f32 %v2024_v43 }
 0xbae   :  { %v2409_v42 = vpop.eup %2408 }
 0xbaf   :  { %697 = vrot.lane.b32.xlu0 %v2409_v42, %s2531_s30 }
 0xbb0   :  { %v2411_v44 = vpop.eup %2410 }
 0xbb1   :  { %v691_v45 = vadd.f32 1.0, %v2411_v44 }
 0xbb3   :  { %2412 = vrcp.f32 %v691_v45 }
 0xbc0   :  { %v2413_v46 = vpop.eup %2412 }
 0xbc1   :  { %v695_v49 = vmul.f32 %v2413_v46, %v602_v33 }
 0xc21   :  { %v698_v47 = vpop.permute.xlu0 %697 }
 0xc22   :  { %v700_v48 = vmul.f32 %v2413_v46, %v698_v47 }
 0xc24   :  { %702 = vrot.lane.b32.xlu1 %v700_v48, %s2532_s3 }
 0xc96   :  { %v703_v50 = vpop.permute.xlu1 %702 }
 0xc97   :  { %v705_v51 = vadd.f32 %v703_v50, %v695_v49 }
 0xc99   :  { %2414 = vtanh.f32 %v705_v51 }
 0xca6   :  { %v2415_v52 = vpop.eup %2414 }
 0xca7   :  { %708 = vrot.lane.b32.xlu0 %v2415_v52, %s2531_s30  ;;  %v2859_v52 = vld [vmem:[%s2991_s6] ss:$0 sm:$0xff] }
 0xd19   :  { %v709_v53 = vpop.permute.xlu0 %708 }
 0xd1a   :  { %v711_v54 = vmul.f32 %v2413_v46, %v709_v53  ;;  %v195_v46 = vadd.f32 %v2721_v58, %v2655_v10 }
 0xd1c   :  { %713 = vrot.lane.b32.xlu1 %v711_v54, %s2532_s3 }
 0xd8e   :  { %v714_v55 = vpop.permute.xlu1 %713 }
 0xd8f   :  { %717 = vst.msk [vmem:[#allocation2 + $0x20] sm:$0xff] %vm202_vm3, %v714_v55  ;;  %2236 = vmatmul.mubr.msk.f32.vlgmr.msra.gmra.mxu1 %vm202_vm3, %v714_v55 }
 0xd90   :  { %2250 = vmatpush3.msra.mxu1 %v2599_v3  ;;  %2257 = vmatprep.mubr.msk.f32.mxu1 %vm2530_vm0, %v2529_v1  ;;  %v185_v3 = vadd.f32 %v2717_v56, %v2655_v10 }
 0xd91   :  { %2251 = vmatprep.subr.mxu1 %v2529_v1 }
 0xd92   :  { %2252 = vmatpush3.msra.mxu1 %v2611_v6 }
 0xd93   :  { %2253 = vmatprep.subr.mxu1 %v2529_v1 }
 0xd94   :  { %2254 = vmatpush3.msra.mxu1 %v2619_v7 }
 0xd95   :  { %2255 = vmatprep.subr.mxu1 %v2529_v1 }
 0xd96   :  { %2256 = vmatpush3.msra.mxu1 %v2627_v8  ;;  %v1031_v22 = vld [vmem:[#allocation2 + $0x20] sm:$0xff] }
 0xd97   :  { %2280 = vmatprep.subr.mxu1 %v2529_v1 }
 0xe4f   :  { %v786_v57 = vpop.f32.mrf.mxu1 }
 0xe50   :  { %v790_v60 = vadd.f32 %v786_v57, %v185_v3 }
 0xe51   :  { %v2237_v61 = vpop.f32.mrf.mxu1 }
 0xe52   :  { %2416 = vtanh.f32 %v790_v60  ;;  %v2026_v6 = vmul.f32 -1.442695, %v790_v60 }
 0xe54   :  { %2418 = vpow2.f32 %v2026_v6 }
 0xe5f   :  { %v2417_v62 = vpop.eup %2416 }
 0xe60   :  { %800 = vrot.lane.b32.xlu0 %v2417_v62, %s2531_s30 }
 0xe61   :  { %v2419_v63 = vpop.eup %2418 }
 0xe62   :  { %v794_v7 = vadd.f32 1.0, %v2419_v63 }
 0xe64   :  { %2420 = vrcp.f32 %v794_v7 }
 0xe71   :  { %v2421_v0 = vpop.eup %2420 }
 0xe72   :  { %v798_v4 = vmul.f32 %v2421_v0, %v705_v51 }
 0xed2   :  { %v801_v2 = vpop.permute.xlu0 %800 }
 0xed3   :  { %v803_v8 = vmul.f32 %v2421_v0, %v801_v2 }
 0xed5   :  { %805 = vrot.lane.b32.xlu1 %v803_v8, %s2532_s3 }
 0xf47   :  { %v806_v5 = vpop.permute.xlu1 %805 }
 0xf48   :  { %v808_v56 = vadd.f32 %v806_v5, %v798_v4 }
 0xf4a   :  { %2422 = vtanh.f32 %v808_v56 }
 0xf57   :  { %v2423_v11 = vpop.eup %2422 }
 0xf58   :  { %811 = vrot.lane.b32.xlu0 %v2423_v11, %s2531_s30 }
 0xfca   :  { %v812_v12 = vpop.permute.xlu0 %811 }
 0xfcb   :  { %v814_v13 = vmul.f32 %v2421_v0, %v812_v12 }
 0xfcd   :  { %816 = vrot.lane.b32.xlu1 %v814_v13, %s2532_s3 }
0x103f   :  { %v817_v14 = vpop.permute.xlu1 %816 }
0x1040   :  { %820 = vst.msk [vmem:[#allocation2 + $0x28] sm:$0xff] %vm202_vm3, %v817_v14  ;;  %2247 = vmatmul.mubr.msk.f32.vlgmr.msra.gmra.mxu0 %vm202_vm3, %v817_v14 }
0x1041   :  { %2261 = vmatpush3.msra.mxu0 %v1038_v9  ;;  %2268 = vmatprep.mubr.msk.f32.mxu0 %vm202_vm3, %v1027_v16 }
0x1042   :  { %2262 = vmatprep.subr.mxu0 %v1037_v15 }
0x1043   :  { %2263 = vmatpush3.msra.mxu0 %v1037_v15 }
0x1044   :  { %2264 = vmatprep.subr.mxu0 %v1036_v17 }
0x1045   :  { %2265 = vmatpush3.msra.mxu0 %v1036_v17 }
0x1046   :  { %2266 = vmatprep.subr.mxu0 %v1035_v18 }
0x1047   :  { %2267 = vmatpush3.msra.mxu0 %v1035_v18  ;;  %v1032_v23 = vld [vmem:[#allocation2 + $0x28] sm:$0xff] }
0x1048   :  { %2269 = vmatmul.mubr.msk.f32.vlgmr.msra.gmra.mxu0 %vm202_vm3, %v1028_v19  ;;  %2302 = vmatprep.subr.mxu0 %v2529_v1 }
0x1049   :  { %2271 = vmatprep.mubr.msk.f32.mxu0 %vm202_vm3, %v1029_v20  ;;  %2303 = vmatpush3.msra.mxu0 %v2811_v38 }
0x104a   :  { %2304 = vmatprep.subr.mxu0 %v2529_v1 }
0x104b   :  { %2305 = vmatpush3.msra.mxu0 %v2814_v39 }
0x104c   :  { %2272 = vmatmul.mubr.msk.f32.gmra.mxu0 %vm202_vm3, %v1030_v21  ;;  %2306 = vmatprep.subr.mxu0 %v2529_v1 }
0x104d   :  { %2274 = vmatprep.mubr.msk.f32.mxu0 %vm202_vm3, %v1031_v22  ;;  %2307 = vmatpush3.msra.mxu0 %v2818_v40 }
0x104e   :  { %2308 = vmatprep.subr.mxu0 %v2529_v1 }
0x104f   :  { %2309 = vmatpush3.msra.mxu0 %v2822_v41 }
0x1050   :  { %2275 = vmatmul.mubr.msk.f32.gmra.mxu0 %vm202_vm3, %v1032_v23  ;;  %2324 = vmatprep.subr.mxu0 %v2529_v1 }
0x1100   :  { %v889_v25 = vpop.f32.mrf.mxu0 }
0x1101   :  { %v893_v26 = vadd.f32 %v889_v25, %v190_v24 }
0x1102   :  { %v2248_v27 = vpop.f32.mrf.mxu0 }
0x1103   :  { %2424 = vtanh.f32 %v893_v26  ;;  %v2028_v29 = vmul.f32 -1.442695, %v893_v26 }
0x1105   :  { %2426 = vpow2.f32 %v2028_v29 }
0x1108   :  { %v2854_v47 = vpop.f32.mrf.mxu0 }
0x1109   :  { %v1142_v22 = vadd.f32 %v2854_v47, %v2859_v52 }
0x110a   :  { %v1136_v51 = vpop.f32.mrf.mxu0 }
0x110b   :  { %v1137_v53 = vadd.f32 %v2859_v52, %v1136_v51 }
0x1110   :  { %v2425_v28 = vpop.eup %2424 }
0x1111   :  { %903 = vrot.lane.b32.xlu0 %v2425_v28, %s2531_s30 }
0x1112   :  { %v2427_v30 = vpop.eup %2426 }
0x1113   :  { %v897_v31 = vadd.f32 1.0, %v2427_v30 }
0x1115   :  { %2428 = vrcp.f32 %v897_v31 }
0x1122   :  { %v2429_v32 = vpop.eup %2428 }
0x1123   :  { %v901_v35 = vmul.f32 %v2429_v32, %v808_v56 }
0x1183   :  { %v904_v33 = vpop.permute.xlu0 %903 }
0x1184   :  { %v906_v34 = vmul.f32 %v2429_v32, %v904_v33 }
0x1186   :  { %908 = vrot.lane.b32.xlu1 %v906_v34, %s2532_s3 }
0x11f8   :  { %v909_v36 = vpop.permute.xlu1 %908 }
0x11f9   :  { %v2807_v59 = vadd.f32 %v909_v36, %v901_v35 }
0x11fb   :  { %2430 = vtanh.f32 %v2807_v59 }
0x1208   :  { %v2431_v37 = vpop.eup %2430 }
0x1209   :  { %914 = vrot.lane.b32.xlu0 %v2431_v37, %s2531_s30 }
0x127b   :  { %v915_v42 = vpop.permute.xlu0 %914 }
0x127c   :  { %v917_v43 = vmul.f32 %v2429_v32, %v915_v42 }
0x127e   :  { %919 = vrot.lane.b32.xlu1 %v917_v43, %s2532_s3 }
0x12f0   :  { %v920_v44 = vpop.permute.xlu1 %919 }
0x12f1   :  { %923 = vst.msk [vmem:[#allocation2 + $0x30] sm:$0xff] %vm202_vm3, %v920_v44  ;;  %2258 = vmatmul.mubr.msk.f32.vlgmr.msra.gmra.mxu1 %vm202_vm3, %v920_v44 }
0x12f2   :  { %2281 = vmatpush3.msra.mxu1 %v2811_v38  ;;  %2288 = vmatprep.mubr.msk.f32.mxu1 %vm2530_vm0, %v2529_v1 }
0x12f3   :  { %2282 = vmatprep.subr.mxu1 %v2529_v1 }
0x12f4   :  { %2283 = vmatpush3.msra.mxu1 %v2814_v39 }
0x12f5   :  { %2284 = vmatprep.subr.mxu1 %v2529_v1 }
0x12f6   :  { %2285 = vmatpush3.msra.mxu1 %v2818_v40 }
0x12f7   :  { %2286 = vmatprep.subr.mxu1 %v2529_v1 }
0x12f8   :  { %2287 = vmatpush3.msra.mxu1 %v2822_v41  ;;  %v1033_v45 = vld [vmem:[#allocation2 + $0x30] sm:$0xff] }
0x12f9   :  { %2289 = vmatmul.mubr.f32.vlgmr.msra.gmra.mxu1 %v2529_v1  ;;  %2277 = vmatprep.mubr.msk.f32.mxu0 %vm202_vm3, %v1033_v45  ;;  %v2273_v45 = vpop.f32.mrf.mxu0 }
0x12fa   :  { %2291 = vmatprep.subr.mxu1 %v2529_v1  ;;  %2299 = vmatprep.mubr.msk.f32.mxu1 %vm2530_vm0, %v2529_v1 }
0x12fb   :  { %2292 = vmatpush3.msra.mxu1 %v2811_v38 }
0x12fc   :  { %2293 = vmatprep.subr.mxu1 %v2529_v1 }
0x12fd   :  { %2294 = vmatpush3.msra.mxu1 %v2814_v39 }
0x12fe   :  { %2295 = vmatprep.subr.mxu1 %v2529_v1 }
0x12ff   :  { %2296 = vmatpush3.msra.mxu1 %v2818_v40 }
0x1300   :  { %2297 = vmatprep.subr.mxu1 %v2529_v1 }
0x1301   :  { %2298 = vmatpush3.msra.mxu1 %v2822_v41 }
0x1302   :  { %2313 = vmatprep.subr.mxu1 %v2529_v1 }
0x13b1   :  { %v992_v48 = vpop.f32.mrf.mxu1 }
0x13b2   :  { %v996_v49 = vadd.f32 %v992_v48, %v195_v46  ;;  %v1146_v46 = vpop.f32.mrf.mxu0 }
0x13b3   :  { %v2259_v50 = vpop.f32.mrf.mxu1  ;;  %v1147_v51 = vadd.f32 %v2859_v52, %v1146_v46 }
0x13b4   :  { %v2030_v4 = vmul.f32 -1.442695, %v996_v49  ;;  %v2903_v47 = vpop.f32.mrf.mxu0 }
0x13b6   :  { %v2905_v48 = vpop.f32.mrf.mxu0 }
0x13b9   :  { %v1245_v54 = vpop.f32.mrf.mxu1 }
0x13ba   :  { %v1249_v55 = vadd.f32 %v1245_v54, %v1137_v53 }
0x13bb   :  { %v2290_v3 = vpop.f32.mrf.mxu1 }
0x13bc   :  { %2432 = vtanh.f32 %v1249_v55  ;;  %v2040_v10 = vmul.f32 -1.442695, %v1249_v55 }
0x13be   :  { %2434 = vpow2.f32 %v2040_v10 }
0x13c9   :  { %v2433_v57 = vpop.eup %2432 }
0x13ca   :  { %1259 = vrot.lane.b32.xlu0 %v2433_v57, %s2531_s30 }
0x13cb   :  { %v2435_v58 = vpop.eup %2434 }
0x13cc   :  { %v1253_v60 = vadd.f32 1.0, %v2435_v58 }
0x13ce   :  { %2436 = vrcp.f32 %v1253_v60 }
0x13db   :  { %v2437_v61 = vpop.eup %2436 }
0x13dc   :  { %v1257_v63 = vmul.f32 0.0, %v2437_v61 }
0x143c   :  { %v1260_v62 = vpop.permute.xlu0 %1259 }
0x143d   :  { %v1262_v6 = vmul.f32 %v2437_v61, %v1260_v62 }
0x143f   :  { %1264 = vrot.lane.b32.xlu1 %v1262_v6, %s2532_s3 }
0x14b1   :  { %v1265_v7 = vpop.permute.xlu1 %1264 }
0x14b2   :  { %v1267_v0 = vadd.f32 %v1265_v7, %v1257_v63 }
0x14b4   :  { %2438 = vtanh.f32 %v1267_v0 }
0x14b5   :  { %2440 = vtanh.f32 %v996_v49 }
0x14b6   :  { %2442 = vpow2.f32 %v2030_v4 }
0x14c1   :  { %v2439_v2 = vpop.eup %2438 }
0x14c2   :  { %1270 = vrot.lane.b32.xlu0 %v2439_v2, %s2531_s30  ;;  %v2441_v8 = vpop.eup %2440 }
0x14c3   :  { %v2443_v5 = vpop.eup %2442 }
0x14c4   :  { %v1000_v56 = vadd.f32 1.0, %v2443_v5  ;;  %v1152_v5 = vadd.f32 %v2273_v45, %v2859_v52 }
0x14c6   :  { %1006 = vrot.lane.b32.xlu0 %v2441_v8, %s2531_s30  ;;  %2444 = vrcp.f32 %v1000_v56 }
0x14d3   :  { %v2445_v12 = vpop.eup %2444 }
0x14d4   :  { %v1004_v16 = vmul.f32 %v2445_v12, %v2807_v59 }
0x1534   :  { %v1271_v9 = vpop.permute.xlu0 %1270 }
0x1535   :  { %v1273_v11 = vmul.f32 %v2437_v61, %v1271_v9 }
0x1537   :  { %1275 = vrot.lane.b32.xlu1 %v1273_v11, %s2532_s3 }
0x1538   :  { %v1007_v13 = vpop.permute.xlu0 %1006 }
0x1539   :  { %v1009_v14 = vmul.f32 %v2445_v12, %v1007_v13 }
0x153b   :  { %1011 = vrot.lane.b32.xlu0 %v1009_v14, %s2532_s3 }
0x15a9   :  { %v1276_v15 = vpop.permute.xlu1 %1275 }
0x15aa   :  { %2300 = vmatmul.mubr.msk.f32.vlgmr.msra.gmra.mxu1 %vm202_vm3, %v1276_v15 }
0x15ab   :  { %2314 = vmatpush3.msra.mxu1 %v2811_v38  ;;  %2321 = vmatprep.mubr.msk.f32.mxu1 %vm2530_vm0, %v2529_v1 }
0x15ac   :  { %2315 = vmatprep.subr.mxu1 %v2529_v1 }
0x15ad   :  { %v1012_v17 = vpop.permute.xlu0 %1011  ;;  %2316 = vmatpush3.msra.mxu1 %v2814_v39 }
0x15ae   :  { %v1014_v18 = vadd.f32 %v1012_v17, %v1004_v16  ;;  %2317 = vmatprep.subr.mxu1 %v2529_v1 }
0x15af   :  { %2318 = vmatpush3.msra.mxu1 %v2818_v40 }
0x15b0   :  { %2446 = vtanh.f32 %v1014_v18  ;;  %2319 = vmatprep.subr.mxu1 %v2529_v1 }
0x15b1   :  { %2320 = vmatpush3.msra.mxu1 %v2822_v41 }
0x15b2   :  { %2335 = vmatprep.subr.mxu1 %v2529_v1 }
0x15bd   :  { %v2447_v19 = vpop.eup %2446 }
0x15be   :  { %1017 = vrot.lane.b32.xlu0 %v2447_v19, %s2531_s30 }
0x1630   :  { %v1018_v20 = vpop.permute.xlu0 %1017 }
0x1631   :  { %v1020_v21 = vmul.f32 %v2445_v12, %v1018_v20 }
0x1633   :  { %1022 = vrot.lane.b32.xlu0 %v1020_v21, %s2532_s3 }
0x166a   :  { %v1345_v23 = vpop.f32.mrf.mxu1 }
0x166b   :  { %v1349_v24 = vadd.f32 %v1345_v23, %v1142_v22 }
0x166c   :  { %v2301_v25 = vpop.f32.mrf.mxu1 }
0x166d   :  { %2448 = vtanh.f32 %v1349_v24  ;;  %v2042_v29 = vmul.f32 -1.442695, %v1349_v24 }
0x166f   :  { %2450 = vpow2.f32 %v2042_v29 }
0x167a   :  { %v2449_v26 = vpop.eup %2448 }
0x167b   :  { %1359 = vrot.lane.b32.xlu1 %v2449_v26, %s2531_s30  ;;  %v1157_v26 = vadd.f32 %v2859_v52, %v2905_v48  ;;  %v1162_v48 = vadd.f32 %v2903_v47, %v2859_v52 }
0x167c   :  { %v2451_v30 = vpop.eup %2450 }
0x167d   :  { %v1353_v31 = vadd.f32 1.0, %v2451_v30 }
0x167f   :  { %2452 = vrcp.f32 %v1353_v31 }
0x168c   :  { %v2453_v32 = vpop.eup %2452 }
0x168d   :  { %v1357_v35 = vmul.f32 %v2453_v32, %v1267_v0 }
0x16a5   :  { %v1023_v27 = vpop.permute.xlu0 %1022 }
0x16a6   :  { %1026 = vst.msk [vmem:[#allocation2 + $0x38] sm:$0xff] %vm202_vm3, %v1023_v27 }
0x16ad   :  { %v1034_v28 = vld [vmem:[#allocation2 + $0x38] sm:$0xff] }
0x16ae   :  { %2278 = vmatmul.mubr.msk.f32.gmra.mxu0 %vm202_vm3, %v1034_v28 }
0x16af   :  { %2310 = vmatprep.mubr.msk.f32.mxu0 %vm2530_vm0, %v2529_v1 }
0x16ed   :  { %v1360_v33 = vpop.permute.xlu1 %1359 }
0x16ee   :  { %v1362_v34 = vmul.f32 %v2453_v32, %v1360_v33 }
0x16f0   :  { %1364 = vrot.lane.b32.xlu1 %v1362_v34, %s2532_s3 }
0x1762   :  { %v1365_v36 = vpop.permute.xlu1 %1364 }
0x1763   :  { %v1367_v59 = vadd.f32 %v1365_v36, %v1357_v35 }
0x1765   :  { %2454 = vtanh.f32 %v1367_v59 }
0x176e   :  { %v2907_v49 = vpop.f32.mrf.mxu0 }
0x1770   :  { %v2909_v50 = vpop.f32.mrf.mxu0 }
0x1772   :  { %v2455_v37 = vpop.eup %2454 }
0x1773   :  { %1370 = vrot.lane.b32.xlu1 %v2455_v37, %s2531_s30 }
0x17e5   :  { %v1371_v42 = vpop.permute.xlu1 %1370 }
0x17e6   :  { %v1373_v43 = vmul.f32 %v2453_v32, %v1371_v42 }
0x17e8   :  { %1375 = vrot.lane.b32.xlu1 %v1373_v43, %s2532_s3 }
0x185a   :  { %v1376_v44 = vpop.permute.xlu1 %1375 }
0x185b   :  { %2311 = vmatmul.mubr.msk.f32.vlgmr.msra.gmra.mxu0 %vm202_vm3, %v1376_v44 }
0x185c   :  { %2325 = vmatpush3.msra.mxu0 %v2811_v38  ;;  %2332 = vmatprep.mubr.msk.f32.mxu0 %vm2530_vm0, %v2529_v1 }
0x185d   :  { %2326 = vmatprep.subr.mxu0 %v2529_v1 }
0x185e   :  { %2327 = vmatpush3.msra.mxu0 %v2814_v39 }
0x185f   :  { %2328 = vmatprep.subr.mxu0 %v2529_v1 }
0x1860   :  { %2329 = vmatpush3.msra.mxu0 %v2818_v40 }
0x1861   :  { %2330 = vmatprep.subr.mxu0 %v2529_v1 }
0x1862   :  { %2331 = vmatpush3.msra.mxu0 %v2822_v41 }
0x1863   :  { %2346 = vmatprep.subr.mxu0 %v2529_v1 }
0x191b   :  { %v1445_v53 = vpop.f32.mrf.mxu0 }
0x191c   :  { %v1449_v54 = vadd.f32 %v1445_v53, %v1147_v51 }
0x191d   :  { %v2312_v55 = vpop.f32.mrf.mxu0 }
0x191e   :  { %2456 = vtanh.f32 %v1449_v54  ;;  %v2044_v57 = vmul.f32 -1.442695, %v1449_v54 }
0x1920   :  { %2458 = vpow2.f32 %v2044_v57 }
0x192b   :  { %v2457_v3 = vpop.eup %2456 }
0x192c   :  { %1459 = vrot.lane.b32.xlu0 %v2457_v3, %s2531_s30 }
0x192d   :  { %v2459_v10 = vpop.eup %2458 }
0x192e   :  { %v1453_v58 = vadd.f32 1.0, %v2459_v10 }
0x1930   :  { %2460 = vrcp.f32 %v1453_v58 }
0x193d   :  { %v2461_v60 = vpop.eup %2460 }
0x193e   :  { %v1457_v6 = vmul.f32 %v2461_v60, %v1367_v59 }
0x199e   :  { %v1460_v61 = vpop.permute.xlu0 %1459 }
0x199f   :  { %v1462_v62 = vmul.f32 %v2461_v60, %v1460_v61 }
0x19a1   :  { %1464 = vrot.lane.b32.xlu1 %v1462_v62, %s2532_s3 }
0x1a13   :  { %v1465_v63 = vpop.permute.xlu1 %1464 }
0x1a14   :  { %v1467_v7 = vadd.f32 %v1465_v63, %v1457_v6  ;;  %v1167_v6 = vadd.f32 %v2859_v52, %v2909_v50 }
0x1a16   :  { %2462 = vtanh.f32 %v1467_v7 }
0x1a23   :  { %v2463_v0 = vpop.eup %2462 }
0x1a24   :  { %1470 = vrot.lane.b32.xlu0 %v2463_v0, %s2531_s30 }
0x1a96   :  { %v1471_v2 = vpop.permute.xlu0 %1470 }
0x1a97   :  { %v1473_v8 = vmul.f32 %v2461_v60, %v1471_v2 }
0x1a99   :  { %1475 = vrot.lane.b32.xlu1 %v1473_v8, %s2532_s3 }
0x1b0b   :  { %v1476_v4 = vpop.permute.xlu1 %1475 }
0x1b0c   :  { %2322 = vmatmul.mubr.msk.f32.vlgmr.msra.gmra.mxu1 %vm202_vm3, %v1476_v4 }
0x1b0d   :  { %2336 = vmatpush3.msra.mxu1 %v2811_v38  ;;  %2343 = vmatprep.mubr.msk.f32.mxu1 %vm2530_vm0, %v2529_v1 }
0x1b0e   :  { %2337 = vmatprep.subr.mxu1 %v2529_v1 }
0x1b0f   :  { %2338 = vmatpush3.msra.mxu1 %v2814_v39 }
0x1b10   :  { %2339 = vmatprep.subr.mxu1 %v2529_v1 }
0x1b11   :  { %2340 = vmatpush3.msra.mxu1 %v2818_v40 }
0x1b12   :  { %2341 = vmatprep.subr.mxu1 %v2529_v1 }
0x1b13   :  { %2342 = vmatpush3.msra.mxu1 %v2822_v41 }
0x1b14   :  { %2357 = vmatprep.subr.mxu1 %v2529_v1 }
0x1bcc   :  { %v1545_v56 = vpop.f32.mrf.mxu1 }
0x1bcd   :  { %v1549_v9 = vadd.f32 %v1545_v56, %v1152_v5 }
0x1bce   :  { %v2323_v11 = vpop.f32.mrf.mxu1 }
0x1bcf   :  { %2464 = vtanh.f32 %v1549_v9  ;;  %v2046_v13 = vmul.f32 -1.442695, %v1549_v9 }
0x1bd1   :  { %2466 = vpow2.f32 %v2046_v13 }
0x1bdc   :  { %v2465_v12 = vpop.eup %2464 }
0x1bdd   :  { %1559 = vrot.lane.b32.xlu0 %v2465_v12, %s2531_s30 }
0x1bde   :  { %v2467_v14 = vpop.eup %2466 }
0x1bdf   :  { %v1553_v15 = vadd.f32 1.0, %v2467_v14 }
0x1be1   :  { %2468 = vrcp.f32 %v1553_v15 }
0x1bee   :  { %v2469_v16 = vpop.eup %2468 }
0x1bef   :  { %v1557_v19 = vmul.f32 %v2469_v16, %v1467_v7 }
0x1c4f   :  { %v1560_v17 = vpop.permute.xlu0 %1559 }
0x1c50   :  { %v1562_v18 = vmul.f32 %v2469_v16, %v1560_v17 }
0x1c52   :  { %1564 = vrot.lane.b32.xlu1 %v1562_v18, %s2532_s3  ;;  %v1172_v18 = vadd.f32 %v2907_v49, %v2859_v52  ;;  %v2055_v52 = vld [vmem:[%s2992_s7] ss:$0 sm:$0xff] }
0x1cc4   :  { %v1565_v20 = vpop.permute.xlu1 %1564 }
0x1cc5   :  { %v1567_v21 = vadd.f32 %v1565_v20, %v1557_v19 }
0x1cc7   :  { %2470 = vtanh.f32 %v1567_v21 }
0x1cd4   :  { %v2471_v22 = vpop.eup %2470 }
0x1cd5   :  { %1570 = vrot.lane.b32.xlu0 %v2471_v22, %s2531_s30 }
0x1d47   :  { %v1571_v23 = vpop.permute.xlu0 %1570 }
0x1d48   :  { %v1573_v24 = vmul.f32 %v2469_v16, %v1571_v23 }
0x1d4a   :  { %1575 = vrot.lane.b32.xlu1 %v1573_v24, %s2532_s3 }
0x1dbc   :  { %v1576_v25 = vpop.permute.xlu1 %1575 }
0x1dbd   :  { %2333 = vmatmul.mubr.msk.f32.vlgmr.msra.gmra.mxu0 %vm202_vm3, %v1576_v25 }
0x1dbe   :  { %2347 = vmatpush3.msra.mxu0 %v2811_v38  ;;  %2354 = vmatprep.mubr.msk.f32.mxu0 %vm2530_vm0, %v2529_v1 }
0x1dbf   :  { %2348 = vmatprep.subr.mxu0 %v2529_v1 }
0x1dc0   :  { %2349 = vmatpush3.msra.mxu0 %v2814_v39 }
0x1dc1   :  { %2350 = vmatprep.subr.mxu0 %v2529_v1 }
0x1dc2   :  { %2351 = vmatpush3.msra.mxu0 %v2818_v40 }
0x1dc3   :  { %2352 = vmatprep.subr.mxu0 %v2529_v1 }
0x1dc4   :  { %2353 = vmatpush3.msra.mxu0 %v2822_v41 }
0x1e7d   :  { %v1645_v27 = vpop.f32.mrf.mxu0 }
0x1e7e   :  { %v1649_v28 = vadd.f32 %v1645_v27, %v1157_v26 }
0x1e7f   :  { %v2334_v29 = vpop.f32.mrf.mxu0 }
0x1e80   :  { %2472 = vtanh.f32 %v1649_v28  ;;  %v2048_v31 = vmul.f32 -1.442695, %v1649_v28 }
0x1e82   :  { %2474 = vpow2.f32 %v2048_v31 }
0x1e8d   :  { %v2473_v30 = vpop.eup %2472 }
0x1e8e   :  { %1659 = vrot.lane.b32.xlu0 %v2473_v30, %s2531_s30 }
0x1e8f   :  { %v2475_v32 = vpop.eup %2474 }
0x1e90   :  { %v1653_v33 = vadd.f32 1.0, %v2475_v32 }
0x1e92   :  { %2476 = vrcp.f32 %v1653_v33 }
0x1e9f   :  { %v2477_v34 = vpop.eup %2476 }
0x1ea0   :  { %v1657_v59 = vmul.f32 %v2477_v34, %v1567_v21 }
0x1f00   :  { %v1660_v35 = vpop.permute.xlu0 %1659 }
0x1f01   :  { %v1662_v36 = vmul.f32 %v2477_v34, %v1660_v35 }
0x1f03   :  { %1664 = vrot.lane.b32.xlu1 %v1662_v36, %s2532_s3 }
0x1f75   :  { %v1665_v37 = vpop.permute.xlu1 %1664 }
0x1f76   :  { %v1667_v42 = vadd.f32 %v1665_v37, %v1657_v59  ;;  %v2056_v37 = vld [vmem:[#allocation3] ss:$0 sm:$0xff] }
0x1f78   :  { %2478 = vtanh.f32 %v1667_v42 }
0x1f85   :  { %v2479_v43 = vpop.eup %2478 }
0x1f86   :  { %1670 = vrot.lane.b32.xlu0 %v2479_v43, %s2531_s30 }
0x1ff8   :  { %v1671_v44 = vpop.permute.xlu0 %1670 }
0x1ff9   :  { %v1673_v45 = vmul.f32 %v2477_v34, %v1671_v44 }
0x1ffb   :  { %1675 = vrot.lane.b32.xlu1 %v1673_v45, %s2532_s3 }
0x206d   :  { %v1676_v46 = vpop.permute.xlu1 %1675 }
0x206e   :  { %2344 = vmatmul.mubr.msk.f32.vlgmr.msra.gmra.mxu1 %vm202_vm3, %v1676_v46 }
0x206f   :  { %2358 = vmatpush3.msra.mxu1 %v2811_v38  ;;  %2365 = vmatprep.mubr.msk.f32.mxu1 %vm2530_vm0, %v2529_v1 }
0x2070   :  { %2359 = vmatprep.subr.mxu1 %v2529_v1 }
0x2071   :  { %2360 = vmatpush3.msra.mxu1 %v2814_v39 }
0x2072   :  { %2361 = vmatprep.subr.mxu1 %v2529_v1 }
0x2073   :  { %2362 = vmatpush3.msra.mxu1 %v2818_v40 }
0x2074   :  { %2363 = vmatprep.subr.mxu1 %v2529_v1 }
0x2075   :  { %2364 = vmatpush3.msra.mxu1 %v2822_v41 }
0x212e   :  { %v1745_v51 = vpop.f32.mrf.mxu1 }
0x212f   :  { %v1749_v38 = vadd.f32 %v1745_v51, %v1162_v48 }
0x2130   :  { %v2345_v53 = vpop.f32.mrf.mxu1 }
0x2131   :  { %2480 = vtanh.f32 %v1749_v38  ;;  %v2050_v55 = vmul.f32 -1.442695, %v1749_v38 }
0x2133   :  { %2482 = vpow2.f32 %v2050_v55 }
0x213e   :  { %v2481_v54 = vpop.eup %2480 }
0x213f   :  { %1759 = vrot.lane.b32.xlu0 %v2481_v54, %s2531_s30 }
0x2140   :  { %v2483_v39 = vpop.eup %2482 }
0x2141   :  { %v1753_v3 = vadd.f32 1.0, %v2483_v39 }
0x2143   :  { %2484 = vrcp.f32 %v1753_v3 }
0x2150   :  { %v2485_v40 = vpop.eup %2484 }
0x2151   :  { %v1757_v41 = vmul.f32 %v2485_v40, %v1667_v42 }
0x21b1   :  { %v1760_v57 = vpop.permute.xlu0 %1759 }
0x21b2   :  { %v1762_v1 = vmul.f32 %v2485_v40, %v1760_v57 }
0x21b4   :  { %1764 = vrot.lane.b32.xlu1 %v1762_v1, %s2532_s3 }
0x2226   :  { %v1765_v10 = vpop.permute.xlu1 %1764 }
0x2227   :  { %v1767_v47 = vadd.f32 %v1765_v10, %v1757_v41 }
0x2229   :  { %2486 = vtanh.f32 %v1767_v47 }
0x2236   :  { %v2487_v58 = vpop.eup %2486 }
0x2237   :  { %1770 = vrot.lane.b32.xlu0 %v2487_v58, %s2531_s30 }
0x22a9   :  { %v1771_v60 = vpop.permute.xlu0 %1770 }
0x22aa   :  { %v1773_v61 = vmul.f32 %v2485_v40, %v1771_v60 }
0x22ac   :  { %1775 = vrot.lane.b32.xlu1 %v1773_v61, %s2532_s3 }
0x231e   :  { %v1776_v62 = vpop.permute.xlu1 %1775 }
0x231f   :  { %2355 = vmatmul.mubr.msk.f32.vlgmr.msra.gmra.mxu0 %vm202_vm3, %v1776_v62 }
0x23df   :  { %v1845_v63 = vpop.f32.mrf.mxu0 }
0x23e0   :  { %v1849_v7 = vadd.f32 %v1845_v63, %v1167_v6 }
0x23e1   :  { %v2356_v0 = vpop.f32.mrf.mxu0 }
0x23e2   :  { %2488 = vtanh.f32 %v1849_v7  ;;  %v2052_v8 = vmul.f32 -1.442695, %v1849_v7 }
0x23e4   :  { %2490 = vpow2.f32 %v2052_v8 }
0x23ef   :  { %v2489_v2 = vpop.eup %2488 }
0x23f0   :  { %1859 = vrot.lane.b32.xlu0 %v2489_v2, %s2531_s30 }
0x23f1   :  { %v2491_v4 = vpop.eup %2490 }
0x23f2   :  { %v1853_v5 = vadd.f32 1.0, %v2491_v4 }
0x23f4   :  { %2492 = vrcp.f32 %v1853_v5 }
0x2401   :  { %v2493_v56 = vpop.eup %2492 }
0x2402   :  { %v1857_v12 = vmul.f32 %v2493_v56, %v1767_v47 }
0x2462   :  { %v1860_v9 = vpop.permute.xlu0 %1859 }
0x2463   :  { %v1862_v11 = vmul.f32 %v2493_v56, %v1860_v9 }
0x2465   :  { %1864 = vrot.lane.b32.xlu1 %v1862_v11, %s2532_s3 }
0x24d7   :  { %v1865_v13 = vpop.permute.xlu1 %1864 }
0x24d8   :  { %v1867_v50 = vadd.f32 %v1865_v13, %v1857_v12 }
0x24da   :  { %2494 = vtanh.f32 %v1867_v50 }
0x24e7   :  { %v2495_v14 = vpop.eup %2494 }
0x24e8   :  { %1870 = vrot.lane.b32.xlu0 %v2495_v14, %s2531_s30 }
0x255a   :  { %v1871_v15 = vpop.permute.xlu0 %1870 }
0x255b   :  { %v1873_v16 = vmul.f32 %v2493_v56, %v1871_v15 }
0x255d   :  { %1875 = vrot.lane.b32.xlu1 %v1873_v16, %s2532_s3 }
0x25cf   :  { %v1876_v17 = vpop.permute.xlu1 %1875 }
0x25d0   :  { %2366 = vmatmul.mubr.msk.f32.vlgmr.msra.gmra.mxu1 %vm202_vm3, %v1876_v17 }
0x2690   :  { %v1945_v19 = vpop.f32.mrf.mxu1 }
0x2691   :  { %v1949_v20 = vadd.f32 %v1945_v19, %v1172_v18 }
0x2692   :  { %v2367_v21 = vpop.f32.mrf.mxu1 }
0x2693   :  { %2496 = vtanh.f32 %v1949_v20  ;;  %v2054_v23 = vmul.f32 -1.442695, %v1949_v20 }
0x2695   :  { %2498 = vpow2.f32 %v2054_v23 }
0x26a0   :  { %v2497_v22 = vpop.eup %2496 }
0x26a1   :  { %1959 = vrot.lane.b32.xlu0 %v2497_v22, %s2531_s30 }
0x26a2   :  { %v2499_v24 = vpop.eup %2498 }
0x26a3   :  { %v1953_v25 = vadd.f32 1.0, %v2499_v24 }
0x26a5   :  { %2500 = vrcp.f32 %v1953_v25 }
0x26b2   :  { %v2501_v26 = vpop.eup %2500 }
0x26b3   :  { %v1957_v49 = vmul.f32 %v2501_v26, %v1867_v50 }
0x2713   :  { %v1960_v27 = vpop.permute.xlu0 %1959 }
0x2714   :  { %v1962_v28 = vmul.f32 %v2501_v26, %v1960_v27 }
0x2716   :  { %1964 = vrot.lane.b32.xlu1 %v1962_v28, %s2532_s3 }
0x271a   :  { %1980 = vrot.lane.b32.xlu1 %v2055_v52, %s2533_s28 }
0x2788   :  { %v1965_v29 = vpop.permute.xlu1 %1964 }
0x2789   :  { %v1967_v30 = vadd.f32 %v1965_v29, %v1957_v49 }
0x278b   :  { %2502 = vtanh.f32 %v1967_v30 }
0x278c   :  { %v1981_v33 = vpop.permute.xlu1 %1980 }
0x2798   :  { %v2503_v31 = vpop.eup %2502 }
0x2799   :  { %1970 = vrot.lane.b32.xlu0 %v2503_v31, %s2531_s30 }
0x280b   :  { %v1971_v32 = vpop.permute.xlu0 %1970 }
0x280c   :  { %v1973_v34 = vmul.f32 %v2501_v26, %v1971_v32 }
0x280e   :  { %v1983_v35 = vmul.f32 %v1981_v33, %v1973_v34 }
0x2810   :  { %1985 = vrot.lane.b32.xlu0 %v1983_v35, %s2532_s3 }
0x2882   :  { %v1986_v36 = vpop.permute.xlu0 %1985 }
0x2883   :  { %v1988_v59 = vsel %vm202_vm3, %v1986_v36, 0.0 }
0x2884   :  { %1989 = vadd.xlane.f32.xlu1 %v1988_v59 }
0x290d   :  { %v1990_v42 = vpop.xlane.xlu1 %1989 }
0x290e   :  { %v1998_v43 = vadd.f32 %v2056_v37, %v1990_v42 }
0x2910   :  { %2000 = vst.msk [vmem:[%s2994_s9] sm:$0xff] %vm1999_vm4, %v1998_v43 }
0x2911   :  { %2005 = vsyncpa [#allocation5], 1 }

</bundles_post_ra>
